<compile_context>
chip_gen: v5e
topology: v5e:2x2
jax: 0.10.0
libtpu: 0.0.40
codegen_flags: <defaults>
</compile_context>

<pallas_src>
import jax
import jax.numpy as jnp
from jax.experimental import pallas as pl
from jax.experimental.pallas import tpu as pltpu


def amf_kernel(x_ref, r_ref,
               wl1_ref, bl1_ref, wl2_ref, bl2_ref,
               wg1_ref, bg1_ref, wg2_ref, bg2_ref,
               o_ref):
    B = x_ref.shape[0]
    HW = x_ref.shape[2]

    xa = x_ref[...] + r_ref[...]                        # (B, C, HW), f32
    xa_bf = xa.astype(jnp.bfloat16)                     # MXU operand

    # ---- global branch: (avgpool * maxpool) over HW, batched over B --------
    avg = jnp.sum(xa, axis=2) * (1.0 / HW)              # (B, C)
    mx = jnp.max(xa, axis=2)                            # (B, C)
    xg_t = jnp.transpose(avg * mx).astype(jnp.bfloat16)  # (C, B)
    # One (Ci, C) @ (C, B) matmul pair covers every batch element.
    g = jnp.dot(wg1_ref[...], xg_t,
                preferred_element_type=jnp.float32) + bg1_ref[...]       # (Ci, B)
    g = jnp.maximum(g, 0.0).astype(jnp.bfloat16)
    xg2 = jnp.dot(wg2_ref[...], g,
                  preferred_element_type=jnp.float32) + bg2_ref[...]     # (C, B)

    # ---- local branch + fuse (HW stays on the lane axis -> lane-dense) -----
    for b in range(B):                                  # B is small & static
        h = jnp.dot(wl1_ref[...], xa_bf[b],
                    preferred_element_type=jnp.float32) + bl1_ref[...]   # (Ci, HW)
        h = jnp.maximum(h, 0.0).astype(jnp.bfloat16)
        xl = jnp.dot(wl2_ref[...], h,
                     preferred_element_type=jnp.float32) + bl2_ref[...]  # (C, HW)
        xlg = xl + xg2[:, b:b + 1]                      # broadcast global over HW
        # Elementwise tail kept in f32 (v5e VPU has no bf16).
        o_ref[b] = xa[b] * jax.nn.sigmoid(xlg)


def amf_forward(x_nchw, res_nchw, params):
    B, C, H, W = x_nchw.shape
    HW = H * W
    # Free reshapes only -- no HBM transpose round-trips.
    x = x_nchw.reshape(B, C, HW)
    r = res_nchw.reshape(B, C, HW)
    wl1, bl1, wl2, bl2, wg1, bg1, wg2, bg2 = params
    Ci = wl1.shape[0]

    # bf16 weights for the MXU; biases stay f32 (added post f32 accumulation).
    wl1 = wl1.astype(jnp.bfloat16)
    wl2 = wl2.astype(jnp.bfloat16)
    wg1 = wg1.astype(jnp.bfloat16)
    wg2 = wg2.astype(jnp.bfloat16)

    def full(shape):
        return pl.BlockSpec(shape, lambda i: (0,) * len(shape))

    out = pl.pallas_call(
        amf_kernel,
        out_shape=jax.ShapeDtypeStruct((B, C, HW), jnp.float32),
        grid=(1,),
        in_specs=[
            full((B, C, HW)), full((B, C, HW)),
            full((Ci, C)), full((Ci, 1)), full((C, Ci)), full((C, 1)),
            full((Ci, C)), full((Ci, 1)), full((C, Ci)), full((C, 1)),
        ],
        out_specs=full((B, C, HW)),
        compiler_params=pltpu.CompilerParams(
            dimension_semantics=("arbitrary",),
            vmem_limit_bytes=32 * 1024 * 1024,
        ),
    )(x, r, wl1, bl1, wl2, bl2, wg1, bg1, wg2, bg2)

    return out.reshape(B, C, H, W)


def init_params(key, channels=64, r=2):
    """Deterministic init. Returns BN-folded conv weights/biases for both branches.

    Weights are stored in PyTorch conv-native orientation (Cout, Cin); biases as
    (Cout, 1) columns so they broadcast along the HW lane axis.
    """
    C, Ci = channels, channels // r
    eps = 1e-5
    ks = jax.random.split(key, 16)

    def conv_w(k, cout, cin):
        return jax.random.normal(k, (cout, cin), jnp.float32) * 0.1

    def bn_fold(kg, kb, n):
        gamma = 1.0 + 0.1 * jax.random.normal(kg, (n,), jnp.float32)
        beta = 0.1 * jax.random.normal(kb, (n,), jnp.float32)
        mean = jnp.zeros((n,), jnp.float32)
        var = jnp.ones((n,), jnp.float32)
        scale = gamma / jnp.sqrt(var + eps)
        shift = beta - mean * scale
        return scale, shift

    def branch(k0, k1, k2, k3, k4, k5, k6, k7):
        w1 = conv_w(k0, Ci, C)
        b1 = 0.1 * jax.random.normal(k1, (Ci,), jnp.float32)
        s1, sh1 = bn_fold(k2, k3, Ci)
        w2 = conv_w(k4, C, Ci)
        b2 = 0.1 * jax.random.normal(k5, (C,), jnp.float32)
        s2, sh2 = bn_fold(k6, k7, C)
        # Fold BN (inference): y = s*(W x + b) + sh == (s[:,None]*W) x + (s*b + sh)
        w1f = w1 * s1[:, None]
        b1f = (b1 * s1 + sh1)[:, None]      # (Ci, 1)
        w2f = w2 * s2[:, None]
        b2f = (b2 * s2 + sh2)[:, None]      # (C, 1)
        return w1f, b1f, w2f, b2f

    local = branch(*ks[0:8])
    glob = branch(*ks[8:16])
    return local + glob


if __name__ == "__main__":
    B, C, H, W = 2, 64, 16, 16          # HW = 256 -> lane-dense stores
    key = jax.random.PRNGKey(0)
    kx, kr, kp = jax.random.split(key, 3)
    x = jax.random.normal(kx, (B, C, H, W), jnp.float32)
    residual = jax.random.normal(kr, (B, C, H, W), jnp.float32)
    params = init_params(kp, channels=C, r=2)

    out = amf_forward(x, residual, params)
    jax.block_until_ready(out)
    assert out.shape == (B, C, H, W)
    print("KERNEL_OK")
</pallas_src>

<mosaic_0001>
module attributes {stable_mosaic.version = 11 : i64} {
  func.func @amf_kernel(%arg0: i32, %arg1: memref<2x64x256xf32, #tpu.memory_space<vmem>>, %arg2: memref<2x64x256xf32, #tpu.memory_space<vmem>>, %arg3: memref<32x64xbf16, #tpu.memory_space<vmem>>, %arg4: memref<32x1xf32, #tpu.memory_space<vmem>>, %arg5: memref<64x32xbf16, #tpu.memory_space<vmem>>, %arg6: memref<64x1xf32, #tpu.memory_space<vmem>>, %arg7: memref<32x64xbf16, #tpu.memory_space<vmem>>, %arg8: memref<32x1xf32, #tpu.memory_space<vmem>>, %arg9: memref<64x32xbf16, #tpu.memory_space<vmem>>, %arg10: memref<64x1xf32, #tpu.memory_space<vmem>>, %arg11: memref<2x64x256xf32, #tpu.memory_space<vmem>>) attributes {dimension_semantics = [#tpu.dimension_semantics<arbitrary>], iteration_bounds = array<i64: 1>, scalar_prefetch = 0 : i64, scratch_operands = 0 : i64, tpu.core_type = #tpu.core_type<tc>, window_params = [{pipeline_mode = #tpu.pipeline_mode<synchronous>, transform_indices = @transform_0, window_bounds = array<i64: 2, 64, 256>}, {pipeline_mode = #tpu.pipeline_mode<synchronous>, transform_indices = @transform_1, window_bounds = array<i64: 2, 64, 256>}, {pipeline_mode = #tpu.pipeline_mode<synchronous>, transform_indices = @transform_2, window_bounds = array<i64: 32, 64>}, {pipeline_mode = #tpu.pipeline_mode<synchronous>, transform_indices = @transform_3, window_bounds = array<i64: 32, 1>}, {pipeline_mode = #tpu.pipeline_mode<synchronous>, transform_indices = @transform_4, window_bounds = array<i64: 64, 32>}, {pipeline_mode = #tpu.pipeline_mode<synchronous>, transform_indices = @transform_5, window_bounds = array<i64: 64, 1>}, {pipeline_mode = #tpu.pipeline_mode<synchronous>, transform_indices = @transform_6, window_bounds = array<i64: 32, 64>}, {pipeline_mode = #tpu.pipeline_mode<synchronous>, transform_indices = @transform_7, window_bounds = array<i64: 32, 1>}, {pipeline_mode = #tpu.pipeline_mode<synchronous>, transform_indices = @transform_8, window_bounds = array<i64: 64, 32>}, {pipeline_mode = #tpu.pipeline_mode<synchronous>, transform_indices = @transform_9, window_bounds = array<i64: 64, 1>}, {pipeline_mode = #tpu.pipeline_mode<synchronous>, transform_indices = @transform_10, window_bounds = array<i64: 2, 64, 256>}]} {
    %c0 = arith.constant 0 : index
    %c0_0 = arith.constant 0 : index
    %c0_1 = arith.constant 0 : index
    %0 = vector.load %arg1[%c0, %c0_0, %c0_1] : memref<2x64x256xf32, #tpu.memory_space<vmem>>, vector<2x64x256xf32>
    %c0_2 = arith.constant 0 : index
    %c0_3 = arith.constant 0 : index
    %c0_4 = arith.constant 0 : index
    %1 = vector.load %arg2[%c0_2, %c0_3, %c0_4] : memref<2x64x256xf32, #tpu.memory_space<vmem>>, vector<2x64x256xf32>
    %2 = arith.addf %0, %1 : vector<2x64x256xf32>
    %3 = arith.truncf %2 : vector<2x64x256xf32> to vector<2x64x256xbf16>
    %cst = arith.constant dense<0.000000e+00> : vector<2x64xf32>
    %4 = vector.multi_reduction <add>, %2, %cst [2] : vector<2x64x256xf32> to vector<2x64xf32>
    %cst_5 = arith.constant 3.906250e-03 : f32
    %5 = vector.broadcast %cst_5 : f32 to vector<2x64xf32>
    %6 = arith.mulf %4, %5 : vector<2x64xf32>
    %cst_6 = arith.constant dense<0xFF800000> : vector<2x64xf32>
    %7 = vector.multi_reduction <maximumf>, %2, %cst_6 [2] : vector<2x64x256xf32> to vector<2x64xf32>
    %8 = arith.mulf %6, %7 : vector<2x64xf32>
    %9 = tpu.transpose %8, [1, 0] : vector<2x64xf32> -> vector<64x2xf32>
    %10 = arith.truncf %9 : vector<64x2xf32> to vector<64x2xbf16>
    %c0_7 = arith.constant 0 : index
    %c0_8 = arith.constant 0 : index
    %11 = vector.load %arg7[%c0_7, %c0_8] : memref<32x64xbf16, #tpu.memory_space<vmem>>, vector<32x64xbf16>
    %cst_9 = arith.constant dense<0.000000e+00> : vector<32x2xf32>
    %12 = tpu.matmul %11, %10, %cst_9 {dimension_numbers = #tpu.dot_dimension_numbers<[1], [0], [0], [1], [0, 0, 1, 1], [], []>} : vector<32x64xbf16>, vector<64x2xbf16>, vector<32x2xf32> -> vector<32x2xf32>
    %c0_10 = arith.constant 0 : index
    %c0_11 = arith.constant 0 : index
    %13 = vector.load %arg8[%c0_10, %c0_11] : memref<32x1xf32, #tpu.memory_space<vmem>>, vector<32x1xf32>
    %14 = vector.broadcast %13 : vector<32x1xf32> to vector<32x2xf32>
    %15 = arith.addf %12, %14 : vector<32x2xf32>
    %cst_12 = arith.constant 0.000000e+00 : f32
    %16 = vector.broadcast %cst_12 : f32 to vector<32x2xf32>
    %17 = arith.maximumf %15, %16 : vector<32x2xf32>
    %18 = arith.truncf %17 : vector<32x2xf32> to vector<32x2xbf16>
    %c0_13 = arith.constant 0 : index
    %c0_14 = arith.constant 0 : index
    %19 = vector.load %arg9[%c0_13, %c0_14] : memref<64x32xbf16, #tpu.memory_space<vmem>>, vector<64x32xbf16>
    %cst_15 = arith.constant dense<0.000000e+00> : vector<64x2xf32>
    %20 = tpu.matmul %19, %18, %cst_15 {dimension_numbers = #tpu.dot_dimension_numbers<[1], [0], [0], [1], [0, 0, 1, 1], [], []>} : vector<64x32xbf16>, vector<32x2xbf16>, vector<64x2xf32> -> vector<64x2xf32>
    %c0_16 = arith.constant 0 : index
    %c0_17 = arith.constant 0 : index
    %21 = vector.load %arg10[%c0_16, %c0_17] : memref<64x1xf32, #tpu.memory_space<vmem>>, vector<64x1xf32>
    %22 = vector.broadcast %21 : vector<64x1xf32> to vector<64x2xf32>
    %23 = arith.addf %20, %22 : vector<64x2xf32>
    %c0_18 = arith.constant 0 : index
    %c0_19 = arith.constant 0 : index
    %24 = vector.load %arg3[%c0_18, %c0_19] : memref<32x64xbf16, #tpu.memory_space<vmem>>, vector<32x64xbf16>
    %25 = vector.extract_strided_slice %3 {offsets = [0, 0, 0], sizes = [1, 64, 256], strides = [1, 1, 1]} : vector<2x64x256xbf16> to vector<1x64x256xbf16>
    %26 = vector.shape_cast %25 : vector<1x64x256xbf16> to vector<64x256xbf16>
    %cst_20 = arith.constant dense<0.000000e+00> : vector<32x256xf32>
    %27 = tpu.matmul %24, %26, %cst_20 {dimension_numbers = #tpu.dot_dimension_numbers<[1], [0], [0], [1], [0, 0, 1, 1], [], []>} : vector<32x64xbf16>, vector<64x256xbf16>, vector<32x256xf32> -> vector<32x256xf32>
    %c0_21 = arith.constant 0 : index
    %c0_22 = arith.constant 0 : index
    %28 = vector.load %arg4[%c0_21, %c0_22] : memref<32x1xf32, #tpu.memory_space<vmem>>, vector<32x1xf32>
    %29 = vector.broadcast %28 : vector<32x1xf32> to vector<32x256xf32>
    %30 = arith.addf %27, %29 : vector<32x256xf32>
    %cst_23 = arith.constant 0.000000e+00 : f32
    %31 = vector.broadcast %cst_23 : f32 to vector<32x256xf32>
    %32 = arith.maximumf %30, %31 : vector<32x256xf32>
    %33 = arith.truncf %32 : vector<32x256xf32> to vector<32x256xbf16>
    %c0_24 = arith.constant 0 : index
    %c0_25 = arith.constant 0 : index
    %34 = vector.load %arg5[%c0_24, %c0_25] : memref<64x32xbf16, #tpu.memory_space<vmem>>, vector<64x32xbf16>
    %cst_26 = arith.constant dense<0.000000e+00> : vector<64x256xf32>
    %35 = tpu.matmul %34, %33, %cst_26 {dimension_numbers = #tpu.dot_dimension_numbers<[1], [0], [0], [1], [0, 0, 1, 1], [], []>} : vector<64x32xbf16>, vector<32x256xbf16>, vector<64x256xf32> -> vector<64x256xf32>
    %c0_27 = arith.constant 0 : index
    %c0_28 = arith.constant 0 : index
    %36 = vector.load %arg6[%c0_27, %c0_28] : memref<64x1xf32, #tpu.memory_space<vmem>>, vector<64x1xf32>
    %37 = vector.broadcast %36 : vector<64x1xf32> to vector<64x256xf32>
    %38 = arith.addf %35, %37 : vector<64x256xf32>
    %39 = vector.extract_strided_slice %23 {offsets = [0, 0], sizes = [64, 1], strides = [1, 1]} : vector<64x2xf32> to vector<64x1xf32>
    %40 = vector.broadcast %39 : vector<64x1xf32> to vector<64x256xf32>
    %41 = arith.addf %38, %40 : vector<64x256xf32>
    %42 = vector.extract_strided_slice %2 {offsets = [0, 0, 0], sizes = [1, 64, 256], strides = [1, 1, 1]} : vector<2x64x256xf32> to vector<1x64x256xf32>
    %43 = vector.shape_cast %42 : vector<1x64x256xf32> to vector<64x256xf32>
    %44 = arith.negf %41 : vector<64x256xf32>
    %45 = math.exp %44 : vector<64x256xf32>
    %cst_29 = arith.constant 1.000000e+00 : f32
    %46 = vector.broadcast %cst_29 : f32 to vector<64x256xf32>
    %47 = arith.addf %46, %45 : vector<64x256xf32>
    %48 = arith.divf %46, %47 : vector<64x256xf32>
    %49 = arith.mulf %43, %48 : vector<64x256xf32>
    %c0_30 = arith.constant 0 : index
    %c0_31 = arith.constant 0 : index
    %c0_32 = arith.constant 0 : index
    %50 = vector.load %arg11[%c0_30, %c0_31, %c0_32] : memref<2x64x256xf32, #tpu.memory_space<vmem>>, vector<1x64x256xf32>
    %51 = vector.shape_cast %50 : vector<1x64x256xf32> to vector<64x256xf32>
    %52 = vector.shape_cast %49 : vector<64x256xf32> to vector<1x64x256xf32>
    tpu.vector_store %arg11[%c0_30, %c0_31, %c0_32], %52 {strides = array<i32>} : memref<2x64x256xf32, #tpu.memory_space<vmem>>, vector<1x64x256xf32>,
    %c0_33 = arith.constant 0 : index
    %c0_34 = arith.constant 0 : index
    %53 = vector.load %arg3[%c0_33, %c0_34] : memref<32x64xbf16, #tpu.memory_space<vmem>>, vector<32x64xbf16>
    %54 = vector.extract_strided_slice %3 {offsets = [1, 0, 0], sizes = [1, 64, 256], strides = [1, 1, 1]} : vector<2x64x256xbf16> to vector<1x64x256xbf16>
    %55 = vector.shape_cast %54 : vector<1x64x256xbf16> to vector<64x256xbf16>
    %cst_35 = arith.constant dense<0.000000e+00> : vector<32x256xf32>
    %56 = tpu.matmul %53, %55, %cst_35 {dimension_numbers = #tpu.dot_dimension_numbers<[1], [0], [0], [1], [0, 0, 1, 1], [], []>} : vector<32x64xbf16>, vector<64x256xbf16>, vector<32x256xf32> -> vector<32x256xf32>
    %c0_36 = arith.constant 0 : index
    %c0_37 = arith.constant 0 : index
    %57 = vector.load %arg4[%c0_36, %c0_37] : memref<32x1xf32, #tpu.memory_space<vmem>>, vector<32x1xf32>
    %58 = vector.broadcast %57 : vector<32x1xf32> to vector<32x256xf32>
    %59 = arith.addf %56, %58 : vector<32x256xf32>
    %cst_38 = arith.constant 0.000000e+00 : f32
    %60 = vector.broadcast %cst_38 : f32 to vector<32x256xf32>
    %61 = arith.maximumf %59, %60 : vector<32x256xf32>
    %62 = arith.truncf %61 : vector<32x256xf32> to vector<32x256xbf16>
    %c0_39 = arith.constant 0 : index
    %c0_40 = arith.constant 0 : index
    %63 = vector.load %arg5[%c0_39, %c0_40] : memref<64x32xbf16, #tpu.memory_space<vmem>>, vector<64x32xbf16>
    %cst_41 = arith.constant dense<0.000000e+00> : vector<64x256xf32>
    %64 = tpu.matmul %63, %62, %cst_41 {dimension_numbers = #tpu.dot_dimension_numbers<[1], [0], [0], [1], [0, 0, 1, 1], [], []>} : vector<64x32xbf16>, vector<32x256xbf16>, vector<64x256xf32> -> vector<64x256xf32>
    %c0_42 = arith.constant 0 : index
    %c0_43 = arith.constant 0 : index
    %65 = vector.load %arg6[%c0_42, %c0_43] : memref<64x1xf32, #tpu.memory_space<vmem>>, vector<64x1xf32>
    %66 = vector.broadcast %65 : vector<64x1xf32> to vector<64x256xf32>
    %67 = arith.addf %64, %66 : vector<64x256xf32>
    %68 = vector.extract_strided_slice %23 {offsets = [0, 1], sizes = [64, 1], strides = [1, 1]} : vector<64x2xf32> to vector<64x1xf32>
    %69 = vector.broadcast %68 : vector<64x1xf32> to vector<64x256xf32>
    %70 = arith.addf %67, %69 : vector<64x256xf32>
    %71 = vector.extract_strided_slice %2 {offsets = [1, 0, 0], sizes = [1, 64, 256], strides = [1, 1, 1]} : vector<2x64x256xf32> to vector<1x64x256xf32>
    %72 = vector.shape_cast %71 : vector<1x64x256xf32> to vector<64x256xf32>
    %73 = arith.negf %70 : vector<64x256xf32>
    %74 = math.exp %73 : vector<64x256xf32>
    %cst_44 = arith.constant 1.000000e+00 : f32
    %75 = vector.broadcast %cst_44 : f32 to vector<64x256xf32>
    %76 = arith.addf %75, %74 : vector<64x256xf32>
    %77 = arith.divf %75, %76 : vector<64x256xf32>
    %78 = arith.mulf %72, %77 : vector<64x256xf32>
    %c1 = arith.constant 1 : index
    %c0_45 = arith.constant 0 : index
    %c0_46 = arith.constant 0 : index
    %79 = vector.load %arg11[%c1, %c0_45, %c0_46] : memref<2x64x256xf32, #tpu.memory_space<vmem>>, vector<1x64x256xf32>
    %80 = vector.shape_cast %79 : vector<1x64x256xf32> to vector<64x256xf32>
    %81 = vector.shape_cast %78 : vector<64x256xf32> to vector<1x64x256xf32>
    tpu.vector_store %arg11[%c1, %c0_45, %c0_46], %81 {strides = array<i32>} : memref<2x64x256xf32, #tpu.memory_space<vmem>>, vector<1x64x256xf32>,
    return
  }
  func.func @transform_0(%arg0: i32) -> (i32, i32, i32) {
    %c0_i32 = arith.constant 0 : i32
    %c0_i32_0 = arith.constant 0 : i32
    %c0_i32_1 = arith.constant 0 : i32
    %c0_i32_2 = arith.constant 0 : i32
    return %c0_i32, %c0_i32_0, %c0_i32_1 : i32, i32, i32
  }
  func.func @transform_1(%arg0: i32) -> (i32, i32, i32) {
    %c0_i32 = arith.constant 0 : i32
    %c0_i32_0 = arith.constant 0 : i32
    %c0_i32_1 = arith.constant 0 : i32
    %c0_i32_2 = arith.constant 0 : i32
    return %c0_i32, %c0_i32_0, %c0_i32_1 : i32, i32, i32
  }
  func.func @transform_2(%arg0: i32) -> (i32, i32) {
    %c0_i32 = arith.constant 0 : i32
    %c0_i32_0 = arith.constant 0 : i32
    %c0_i32_1 = arith.constant 0 : i32
    return %c0_i32, %c0_i32_0 : i32, i32
  }
  func.func @transform_3(%arg0: i32) -> (i32, i32) {
    %c0_i32 = arith.constant 0 : i32
    %c0_i32_0 = arith.constant 0 : i32
    %c0_i32_1 = arith.constant 0 : i32
    return %c0_i32, %c0_i32_0 : i32, i32
  }
  func.func @transform_4(%arg0: i32) -> (i32, i32) {
    %c0_i32 = arith.constant 0 : i32
    %c0_i32_0 = arith.constant 0 : i32
    %c0_i32_1 = arith.constant 0 : i32
    return %c0_i32, %c0_i32_0 : i32, i32
  }
  func.func @transform_5(%arg0: i32) -> (i32, i32) {
    %c0_i32 = arith.constant 0 : i32
    %c0_i32_0 = arith.constant 0 : i32
    %c0_i32_1 = arith.constant 0 : i32
    return %c0_i32, %c0_i32_0 : i32, i32
  }
  func.func @transform_6(%arg0: i32) -> (i32, i32) {
    %c0_i32 = arith.constant 0 : i32
    %c0_i32_0 = arith.constant 0 : i32
    %c0_i32_1 = arith.constant 0 : i32
    return %c0_i32, %c0_i32_0 : i32, i32
  }
  func.func @transform_7(%arg0: i32) -> (i32, i32) {
    %c0_i32 = arith.constant 0 : i32
    %c0_i32_0 = arith.constant 0 : i32
    %c0_i32_1 = arith.constant 0 : i32
    return %c0_i32, %c0_i32_0 : i32, i32
  }
  func.func @transform_8(%arg0: i32) -> (i32, i32) {
    %c0_i32 = arith.constant 0 : i32
    %c0_i32_0 = arith.constant 0 : i32
    %c0_i32_1 = arith.constant 0 : i32
    return %c0_i32, %c0_i32_0 : i32, i32
  }
  func.func @transform_9(%arg0: i32) -> (i32, i32) {
    %c0_i32 = arith.constant 0 : i32
    %c0_i32_0 = arith.constant 0 : i32
    %c0_i32_1 = arith.constant 0 : i32
    return %c0_i32, %c0_i32_0 : i32, i32
  }
  func.func @transform_10(%arg0: i32) -> (i32, i32, i32) {
    %c0_i32 = arith.constant 0 : i32
    %c0_i32_0 = arith.constant 0 : i32
    %c0_i32_1 = arith.constant 0 : i32
    %c0_i32_2 = arith.constant 0 : i32
    return %c0_i32, %c0_i32_0, %c0_i32_1 : i32, i32, i32
  }
}

</mosaic_0001>

<bundles_post_ra>
// kernel: tpu_custom_call.1
= control target key start
LH: loop header
LB: loop body
LE: loop exit
PB: predicated region body
PF: predicated region fallthrough
CT: control target
= control target key end

     0   :  { %15 = vsyncpa [#allocation3], 0  ;;  %s3444_s0 = inlined_call_operand.hbm [shape: f32[2,64,256], index: 0, kind: input, shape index: {}]   ;;  %s3445_s1 = inlined_call_operand.hbm [shape: f32[2,64,256], index: 1, kind: input, shape index: {}]   ;;  %s3446_s2 = inlined_call_operand.vmem [shape: bf16[32,64], index: 2, kind: input, shape index: {}]   ;;  %s3447_s3 = inlined_call_operand.vmem [shape: f32[32,1], index: 3, kind: input, shape index: {}]   ;;  %s3448_s4 = inlined_call_operand.vmem [shape: bf16[64,32], index: 4, kind: input, shape index: {}]   ;;  %s3449_s5 = inlined_call_operand.vmem [shape: f32[64,1], index: 5, kind: input, shape index: {}]   ;;  %s3450_s6 = inlined_call_operand.vmem [shape: bf16[32,64], index: 6, kind: input, shape index: {}]   ;;  %s3451_s7 = inlined_call_operand.vmem [shape: f32[32,1], index: 7, kind: input, shape index: {}]   ;;  %s3452_s8 = inlined_call_operand.vmem [shape: bf16[64,32], index: 8, kind: input, shape index: {}]   ;;  %s3453_s9 = inlined_call_operand.vmem [shape: f32[64,1], index: 9, kind: input, shape index: {}]   ;;  %s3454_s10 = inlined_call_operand.hbm [shape: f32[2,64,256], index: 10, kind: output, shape index: {}]  }
   0x1   :  { %16 = vsyncpa [#allocation6], 0 }
   0x2   :  { %17 = vsyncpa [#allocation4], 0  ;;  %s22_s15 = sshll.u32 %s3444_s0, 4  ;;  %s2337_s16 = smov [#allocation2]   ;;  %s23_s15 = int_to_ptr.hbm [resolvable:$true] %s22_s15 }
   0x3   :  { %s24_s17 = sshll.u32 %s2337_s16, 4  ;;  %s35_s20 = sshll.u32 %s3445_s1, 4  ;;  %s25_s17 = int_to_ptr.vmem [resolvable:$true] %s24_s17  ;;  %s36_s20 = int_to_ptr.hbm [resolvable:$true] %s35_s20 }
   0x4   :  { %s2338_s21 = smov 256   ;;  %s2339_s22 = smov 16  }
   0x5   :  { %30 = dma.hbm_to_vmem [thread:$0]  %s23_s15, 4096, %s25_s17, [#allocation3], %s2338_s21, %s2338_s21, %s2339_s22  }
   0x6   :  { %s2340_s23 = smov [#allocation5]  }
   0x7   :  { %s37_s24 = sshll.u32 %s2340_s23, 4  ;;  %s38_s24 = int_to_ptr.vmem [resolvable:$true] %s37_s24 }
   0x8   :  { %43 = dma.hbm_to_vmem [thread:$0]  %s36_s20, 4096, %s38_s24, [#allocation6], %s2338_s21, %s2338_s21, %s2339_s22  }
   0x9   :  { %2331 = dma.done.wait [#allocation3], 4096  }
   0xa   :  { %2332 = vsyncadd [#allocation3], 4294963200 }
   0xb   :  { %2333 = dma.done.wait [#allocation6], 4096  }
   0xc   :  { %2334 = vsyncadd [#allocation6], 4294963200  ;;  %v85_v0 = vld [vmem:[#allocation2 + $0x80] sm:$0xff]  ;;  %v86_v1 = vld [vmem:[#allocation2 + $0x88] sm:$0xff]  ;;  %vm330_vm0 = vcmask 130112   ;;  %vm448_vm1 = vcmask 523264  }
   0xd   :  { %v117_v2 = vld [vmem:[#allocation5 + $0x80] sm:$0xff]  ;;  %v118_v3 = vld [vmem:[#allocation5 + $0x88] sm:$0xff]  ;;  %v87_v19 = vld [vmem:[#allocation2 + $0x90] sm:$0xff]  ;;  %vm334_vm2 = vcmask 195712   ;;  %vm338_vm3 = vcmask 261312   ;;  %vm342_vm4 = vcmask 326912  }
   0xe   :  { %v2411_v4 = vadd.f32 %v117_v2, %v85_v0  ;;  %v73_v5 = vld [vmem:[#allocation2 + $0x20] sm:$0xff]  ;;  %v74_v6 = vld [vmem:[#allocation2 + $0x28] sm:$0xff]  ;;  %v2413_v7 = vadd.f32 %v118_v3, %v86_v1  ;;  %v88_v20 = vld [vmem:[#allocation2 + $0x98] sm:$0xff]  ;;  %vm346_vm5 = vcmask 392512   ;;  %vm350_vm6 = vcmask 458112   ;;  %s1941_s17 = sshll.u32 %s3454_s10, 4  ;;  %s1942_s17 = int_to_ptr.hbm [resolvable:$true] %s1941_s17 }
   0xf   :  { %v105_v8 = vld [vmem:[#allocation5 + $0x20] sm:$0xff]  ;;  %v106_v9 = vld [vmem:[#allocation5 + $0x28] sm:$0xff]  ;;  %v119_v21 = vld [vmem:[#allocation5 + $0x90] sm:$0xff]  ;;  %vm354_vm7 = vcmask 523712   ;;  %vm371_vm8 = vcmask 1041409   ;;  %vm556_vm9 = vcmask 261120  }
  0x10   :  { %3486 = vst [vmem:[#allocation11_spill] sm:$0xff] %v2411_v4  ;;  %v69_v10 = vld [vmem:[#allocation2] sm:$0xff]  ;;  %v2415_v11 = vadd.f32 %v105_v8, %v73_v5  ;;  %v2417_v12 = vadd.f32 %v106_v9, %v74_v6  ;;  %v70_v13 = vld [vmem:[#allocation2 + $0x8] sm:$0xff]  ;;  %v205_v16 = vadd.f32 %v2413_v7, %v2411_v4  ;;  %v120_v23 = vld [vmem:[#allocation5 + $0x98] sm:$0xff]  ;;  %v2429_v27 = vadd.f32 %v119_v21, %v87_v19 }
  0x11   :  { %3487 = vst [vmem:[#allocation12_spill] sm:$0xff] %v2413_v7  ;;  %v101_v14 = vld [vmem:[#allocation5] sm:$0xff]  ;;  %v102_v15 = vld [vmem:[#allocation5 + $0x8] sm:$0xff]  ;;  %v2431_v28 = vadd.f32 %v120_v23, %v88_v20  ;;  %v71_v31 = vld [vmem:[#allocation2 + $0x10] sm:$0xff]  ;;  %v269_v57 = vmax.f32 %v2411_v4, %v2413_v7 }
  0x12   :  { %3488 = vst [vmem:[#allocation13_spill] sm:$0xff] %v2415_v11  ;;  %v2421_v17 = vadd.f32 %v101_v14, %v69_v10  ;;  %v2423_v18 = vadd.f32 %v102_v15, %v70_v13  ;;  %v187_v22 = vadd.f32 %v2417_v12, %v2415_v11  ;;  %v89_v24 = vld [vmem:[#allocation2 + $0xa0] sm:$0xff]  ;;  %v90_v25 = vld [vmem:[#allocation2 + $0xa8] sm:$0xff]  ;;  %206 = vadd.xlane.f32.xlu1 %v205_v16  ;;  %v72_v34 = vld [vmem:[#allocation2 + $0x18] sm:$0xff] }
  0x13   :  { %3489 = vst [vmem:[#allocation14_spill] sm:$0xff] %v2417_v12  ;;  %v121_v29 = vld [vmem:[#allocation5 + $0xa0] sm:$0xff]  ;;  %v122_v30 = vld [vmem:[#allocation5 + $0xa8] sm:$0xff]  ;;  %v103_v35 = vld [vmem:[#allocation5 + $0x10] sm:$0xff]  ;;  %v208_v39 = vadd.f32 %v2431_v28, %v2429_v27  ;;  %v272_v59 = vmax.f32 %v2429_v27, %v2431_v28  ;;  %v251_v15 = vmax.f32 %v2415_v11, %v2417_v12 }
  0x14   :  { %3490 = vst [vmem:[#allocation15_spill] sm:$0xff] %v2421_v17  ;;  %v181_v26 = vadd.f32 %v2423_v18, %v2421_v17  ;;  %188 = vadd.xlane.f32.xlu2 %v187_v22  ;;  %v2433_v32 = vadd.f32 %v121_v29, %v89_v24  ;;  %v2435_v33 = vadd.f32 %v122_v30, %v90_v25  ;;  %v104_v36 = vld [vmem:[#allocation5 + $0x18] sm:$0xff]  ;;  %v91_v40 = vld [vmem:[#allocation2 + $0xb0] sm:$0xff]  ;;  %v93_v58 = vld [vmem:[#allocation2 + $0xc0] sm:$0xff] }
  0x15   :  { %3491 = vst [vmem:[#allocation16_spill] sm:$0xff] %v2423_v18  ;;  %v2437_v37 = vadd.f32 %v103_v35, %v71_v31  ;;  %v2439_v38 = vadd.f32 %v104_v36, %v72_v34  ;;  %v92_v42 = vld [vmem:[#allocation2 + $0xb8] sm:$0xff]  ;;  %v123_v43 = vld [vmem:[#allocation5 + $0xb0] sm:$0xff]  ;;  %v245_v55 = vmax.f32 %v2421_v17, %v2423_v18  ;;  %v94_v60 = vld [vmem:[#allocation2 + $0xc8] sm:$0xff] }
  0x16   :  { %3492 = vst [vmem:[#allocation17_spill] sm:$0xff] %v2431_v28  ;;  %182 = vadd.xlane.f32.xlu0 %v181_v26  ;;  %v211_v41 = vadd.f32 %v2435_v33, %v2433_v32  ;;  %v124_v44 = vld [vmem:[#allocation5 + $0xb8] sm:$0xff]  ;;  %v75_v46 = vld [vmem:[#allocation2 + $0x30] sm:$0xff]  ;;  %v2447_v50 = vadd.f32 %v123_v43, %v91_v40  ;;  %v125_v61 = vld [vmem:[#allocation5 + $0xc0] sm:$0xff]  ;;  %v275_v36 = vmax.f32 %v2433_v32, %v2435_v33 }
  0x17   :  { %3493 = vst [vmem:[#allocation18_spill] sm:$0xff] %v2433_v32  ;;  %v184_v45 = vadd.f32 %v2439_v38, %v2437_v37  ;;  %v76_v47 = vld [vmem:[#allocation2 + $0x38] sm:$0xff]  ;;  %v107_v48 = vld [vmem:[#allocation5 + $0x30] sm:$0xff]  ;;  %v2449_v51 = vadd.f32 %v124_v44, %v92_v42  ;;  %v126_v62 = vld [vmem:[#allocation5 + $0xc8] sm:$0xff]  ;;  %v248_v63 = vmax.f32 %v2437_v37, %v2439_v38  ;;  %v2467_v5 = vadd.f32 %v125_v61, %v93_v58 }
  0x18   :  { %3494 = vst [vmem:[#allocation19_spill] sm:$0xff] %v2435_v33  ;;  %v108_v49 = vld [vmem:[#allocation5 + $0x38] sm:$0xff]  ;;  %v2451_v52 = vadd.f32 %v107_v48, %v75_v46  ;;  %v77_v0 = vld [vmem:[#allocation2 + $0x40] sm:$0xff]  ;;  %v78_v1 = vld [vmem:[#allocation2 + $0x48] sm:$0xff]  ;;  %v2469_v6 = vadd.f32 %v126_v62, %v94_v60 }
  0x19   :  { %3495 = vst [vmem:[#allocation20_spill] sm:$0xff] %v2437_v37  ;;  %v2453_v53 = vadd.f32 %v108_v49, %v76_v47  ;;  %v214_v54 = vadd.f32 %v2449_v51, %v2447_v50  ;;  %v109_v2 = vld [vmem:[#allocation5 + $0x40] sm:$0xff]  ;;  %v110_v3 = vld [vmem:[#allocation5 + $0x48] sm:$0xff]  ;;  %v79_v13 = vld [vmem:[#allocation2 + $0x50] sm:$0xff]  ;;  %v278_v44 = vmax.f32 %v2447_v50, %v2449_v51 }
  0x1a   :  { %3496 = vst [vmem:[#allocation21_spill] sm:$0xff] %v2439_v38  ;;  %209 = vadd.xlane.f32.xlu1 %v208_v39  ;;  %v2471_v8 = vadd.f32 %v109_v2, %v77_v0  ;;  %v2473_v9 = vadd.f32 %v110_v3, %v78_v1  ;;  %v217_v10 = vadd.f32 %v2469_v6, %v2467_v5  ;;  %v80_v14 = vld [vmem:[#allocation2 + $0x58] sm:$0xff]  ;;  %v111_v16 = vld [vmem:[#allocation5 + $0x50] sm:$0xff]  ;;  %v81_v35 = vld [vmem:[#allocation2 + $0x60] sm:$0xff] }
  0x1b   :  { %3497 = vst [vmem:[#allocation22_spill] sm:$0xff] %v2447_v50  ;;  %v190_v56 = vadd.f32 %v2453_v53, %v2451_v52  ;;  %v112_v19 = vld [vmem:[#allocation5 + $0x58] sm:$0xff]  ;;  %v95_v20 = vld [vmem:[#allocation2 + $0xd0] sm:$0xff]  ;;  %v2481_v25 = vadd.f32 %v111_v16, %v79_v13  ;;  %v82_v39 = vld [vmem:[#allocation2 + $0x68] sm:$0xff]  ;;  %v254_v46 = vmax.f32 %v2451_v52, %v2453_v53 }
  0x1c   :  { %3498 = vst [vmem:[#allocation23_spill] sm:$0xff] %v2449_v51  ;;  %212 = vadd.xlane.f32.xlu2 %v211_v41  ;;  %v193_v21 = vadd.f32 %v2473_v9, %v2471_v8  ;;  %v96_v22 = vld [vmem:[#allocation2 + $0xd8] sm:$0xff]  ;;  %v127_v23 = vld [vmem:[#allocation5 + $0xd0] sm:$0xff]  ;;  %v2483_v26 = vadd.f32 %v112_v19, %v80_v14  ;;  %v113_v40 = vld [vmem:[#allocation5 + $0x60] sm:$0xff] }
  0x1d   :  { %3499 = vst [vmem:[#allocation24_spill] sm:$0xff] %v2451_v52  ;;  %v128_v24 = vld [vmem:[#allocation5 + $0xd8] sm:$0xff]  ;;  %v2485_v29 = vadd.f32 %v127_v23, %v95_v20  ;;  %v114_v41 = vld [vmem:[#allocation5 + $0x68] sm:$0xff]  ;;  %v2495_v42 = vadd.f32 %v113_v40, %v81_v35  ;;  %v97_v47 = vld [vmem:[#allocation2 + $0xe0] sm:$0xff] }
  0x1e   :  { %185 = vadd.xlane.f32.xlu0 %v184_v45  ;;  %3500 = vst [vmem:[#allocation25_spill] sm:$0xff] %v2453_v53  ;;  %v2487_v30 = vadd.f32 %v128_v24, %v96_v22  ;;  %v196_v31 = vadd.f32 %v2483_v26, %v2481_v25  ;;  %v2497_v43 = vadd.f32 %v114_v41, %v82_v39  ;;  %v98_v48 = vld [vmem:[#allocation2 + $0xe8] sm:$0xff]  ;;  %v129_v49 = vld [vmem:[#allocation5 + $0xe0] sm:$0xff]  ;;  %v99_v58 = vld [vmem:[#allocation2 + $0xf0] sm:$0xff] }
  0x1f   :  { %3501 = vst [vmem:[#allocation26_spill] sm:$0xff] %v2469_v6  ;;  %v100_v60 = vld [vmem:[#allocation2 + $0xf8] sm:$0xff]  ;;  %v131_v61 = vld [vmem:[#allocation5 + $0xf0] sm:$0xff]  ;;  %v260_v19 = vmax.f32 %v2481_v25, %v2483_v26 }
  0x20   :  { %3502 = vst [vmem:[#allocation27_spill] sm:$0xff] %v2471_v8  ;;  %v220_v34 = vadd.f32 %v2487_v30, %v2485_v29  ;;  %v199_v45 = vadd.f32 %v2497_v43, %v2495_v42  ;;  %v132_v62 = vld [vmem:[#allocation5 + $0xf8] sm:$0xff]  ;;  %v83_v0 = vld [vmem:[#allocation2 + $0x70] sm:$0xff]  ;;  %v284_v23 = vmax.f32 %v2485_v29, %v2487_v30 }
  0x21   :  { %3503 = vst [vmem:[#allocation28_spill] sm:$0xff] %v2473_v9  ;;  %v84_v1 = vld [vmem:[#allocation2 + $0x78] sm:$0xff]  ;;  %v115_v2 = vld [vmem:[#allocation5 + $0x70] sm:$0xff]  ;;  %v2517_v13 = vadd.f32 %v132_v62, %v100_v60 }
  0x22   :  { %215 = vadd.xlane.f32.xlu1 %v214_v54  ;;  %3504 = vst [vmem:[#allocation29_spill] sm:$0xff] %v2481_v25  ;;  %v130_v54 = vld [vmem:[#allocation5 + $0xe8] sm:$0xff]  ;;  %v116_v3 = vld [vmem:[#allocation5 + $0x78] sm:$0xff]  ;;  %v2519_v14 = vadd.f32 %v115_v2, %v83_v0  ;;  %v2567_v0 = vpack.c.bf16 %v2417_v12, %v2415_v11 }
  0x23   :  { %3505 = vst [vmem:[#allocation30_spill] sm:$0xff] %v2483_v26 }
  0x24   :  { %246 = vmax.xlane.f32.xlu2 %v245_v55  ;;  %3506 = vst [vmem:[#allocation31_spill] sm:$0xff] %v2485_v29  ;;  %v2505_v55 = vadd.f32 %v129_v49, %v97_v47  ;;  %v2553_v49 = vpack.c.bf16 %v2473_v9, %v2471_v8  ;;  %v649_v2 = vunpack.c.h.b16 %v2567_v0 }
  0x25   :  { %3507 = vst [vmem:[#allocation32_spill] sm:$0xff] %v2487_v30 }
  0x26   :  { %191 = vadd.xlane.f32.xlu0 %v190_v56  ;;  %3508 = vst [vmem:[#allocation33_spill] sm:$0xff] %v2495_v42  ;;  %v2507_v56 = vadd.f32 %v130_v54, %v98_v48  ;;  %v2557_v54 = vpack.c.bf16 %v2483_v26, %v2481_v25 }
  0x27   :  { %3509 = vst [vmem:[#allocation34_spill] sm:$0xff] %v2497_v43 }
  0x28   :  { %3510 = vst [vmem:[#allocation35_spill] sm:$0xff] %v2507_v56  ;;  %v287_v22 = vmax.f32 %v2505_v55, %v2507_v56 }
  0x29   :  { %3512 = vst [vmem:[#allocation37_spill] sm:$0xff] %v2517_v13 }
  0x2a   :  { %270 = vmax.xlane.f32.xlu1 %v269_v57  ;;  %v257_v57 = vmax.f32 %v2471_v8, %v2473_v9  ;;  %3513 = vst [vmem:[#allocation38_spill] sm:$0xff] %v2519_v14 }
  0x2c   :  { %273 = vmax.xlane.f32.xlu2 %v272_v59  ;;  %v281_v59 = vmax.f32 %v2467_v5, %v2469_v6 }
  0x2e   :  { %249 = vmax.xlane.f32.xlu0 %v248_v63  ;;  %v223_v63 = vadd.f32 %v2507_v56, %v2505_v55 }
  0x32   :  { %218 = vadd.xlane.f32.xlu1 %v217_v10  ;;  %v2515_v10 = vadd.f32 %v131_v61, %v99_v58  ;;  %v653_v58 = vunpack.c.h.b16 %v2553_v49  ;;  %v325_v61 = vlaneseq }
  0x34   :  { %252 = vmax.xlane.f32.xlu2 %v251_v15  ;;  %3511 = vst [vmem:[#allocation36_spill] sm:$0xff] %v2515_v10  ;;  %v2521_v15 = vadd.f32 %v116_v3, %v84_v1  ;;  %v226_v16 = vadd.f32 %v2517_v13, %v2515_v10  ;;  %v290_v24 = vmax.f32 %v2515_v10, %v2517_v13 }
  0x35   :  { %v2571_v1 = vpack.c.bf16 %v2453_v53, %v2451_v52  ;;  %v2593_v53 = vld [vmem:[%s3446_s2] sm:$0xff] }
  0x36   :  { %194 = vadd.xlane.f32.xlu0 %v193_v21  ;;  %3514 = vst [vmem:[#allocation39_spill] sm:$0xff] %v2521_v15  ;;  %v202_v20 = vadd.f32 %v2521_v15, %v2519_v14  ;;  %v263_v21 = vmax.f32 %v2495_v42, %v2497_v43 }
  0x37   :  { %v651_v3 = vunpack.c.h.b16 %v2571_v1 }
  0x3a   :  { %197 = vadd.xlane.f32.xlu1 %v196_v31  ;;  %v266_v31 = vmax.f32 %v2519_v14, %v2521_v15 }
  0x3c   :  { %221 = vadd.xlane.f32.xlu2 %v220_v34 }
  0x3e   :  { %276 = vmax.xlane.f32.xlu0 %v275_v36 }
  0x42   :  { %279 = vmax.xlane.f32.xlu1 %v278_v44  ;;  %v2543_v44 = vpack.c.bf16 %v2497_v43, %v2495_v42 }
  0x44   :  { %200 = vadd.xlane.f32.xlu2 %v199_v45  ;;  %v2547_v45 = vpack.c.bf16 %v2521_v15, %v2519_v14  ;;  %v656_v8 = vunpack.c.l.b16 %v2543_v44 }
  0x46   :  { %255 = vmax.xlane.f32.xlu0 %v254_v46  ;;  %v657_v46 = vunpack.c.h.b16 %v2543_v44  ;;  %v659_v47 = vunpack.c.h.b16 %v2547_v45 }
  0x48   :  { %v667_v48 = vpack.c.b16 %v659_v47, %v657_v46 }
  0x4a   :  { %258 = vmax.xlane.f32.xlu1 %v257_v57  ;;  %705 = vmatpush.bf16.msra.mxu3 %v667_v48 }
  0x4c   :  { %282 = vmax.xlane.f32.xlu2 %v281_v59  ;;  %v655_v59 = vunpack.c.h.b16 %v2557_v54 }
  0x4e   :  { %224 = vadd.xlane.f32.xlu0 %v223_v63  ;;  %v665_v63 = vpack.c.b16 %v655_v59, %v653_v58 }
  0x50   :  { %706 = vmatpush.bf16.msra.mxu3 %v665_v63 }
  0x52   :  { %227 = vadd.xlane.f32.xlu1 %v226_v16  ;;  %v2575_v16 = vand.u32 127, %v325_v61 }
  0x54   :  { %261 = vmax.xlane.f32.xlu2 %v260_v19  ;;  %v663_v19 = vpack.c.b16 %v651_v3, %v649_v2  ;;  %v328_v46 = vadd.s32 4294967288, %v2575_v16  ;;  %v336_v52 = vadd.s32 4294967272, %v2575_v16  ;;  %v340_v42 = vadd.s32 4294967264, %v2575_v16 }
  0x56   :  { %203 = vadd.xlane.f32.xlu0 %v202_v20  ;;  %v2579_v20 = vpack.c.bf16 %v2423_v18, %v2421_v17  ;;  %707 = vmatpush.bf16.msra.mxu3 %v663_v19  ;;  %v658_v18 = vunpack.c.l.b16 %v2547_v45  ;;  %v2089_v45 = vld [vmem:[%s3450_s6] sm:$0xff] }
  0x58   :  { %v645_v47 = vunpack.c.h.b16 %v2579_v20 }
  0x5a   :  { %264 = vmax.xlane.f32.xlu1 %v263_v21  ;;  %v2583_v21 = vpack.c.bf16 %v2439_v38, %v2437_v37 }
  0x5c   :  { %288 = vmax.xlane.f32.xlu2 %v287_v22  ;;  %v647_v48 = vunpack.c.h.b16 %v2583_v21 }
  0x5e   :  { %285 = vmax.xlane.f32.xlu0 %v284_v23  ;;  %v661_v15 = vpack.c.b16 %v647_v48, %v645_v47 }
  0x60   :  { %708 = vmatpush.bf16.msra.mxu3 %v661_v15 }
  0x62   :  { %291 = vmax.xlane.f32.xlu1 %v290_v24 }
  0x63   :  { %1995 = vmatmul.msk.bf16.vlgmr.msra.gmra.mxu3 %vm448_vm1, %v2593_v53 }
  0x66   :  { %267 = vmax.xlane.f32.xlu0 %v266_v31 }
  0x85   :  { %v207_v34 = vpop.xlane.xlu1 %206 }
  0x86   :  { %v237_v22 = vmul.f32 0.00390625, %v207_v34 }
  0x87   :  { %v189_v35 = vpop.xlane.xlu2 %188 }
  0x89   :  { %v183_v36 = vpop.xlane.xlu0 %182 }
  0x8a   :  { %v229_v23 = vmul.f32 0.00390625, %v183_v36 }
  0x8d   :  { %v210_v39 = vpop.xlane.xlu1 %209 }
  0x8e   :  { %v238_v24 = vmul.f32 0.00390625, %v210_v39 }
  0x8f   :  { %v2539_v40 = vpop.xlane.xlu2 %212 }
  0x91   :  { %v186_v41 = vpop.xlane.xlu0 %185 }
  0x92   :  { %v230_v58 = vmul.f32 0.00390625, %v186_v41 }
  0x95   :  { %v2559_v57 = vpop.xlane.xlu1 %215 }
  0x97   :  { %v247_v60 = vpop.xlane.xlu2 %246 }
  0x98   :  { %v293_v59 = vmul.f32 %v247_v60, %v229_v23 }
  0x99   :  { %v2563_v62 = vpop.xlane.xlu0 %191 }
  0x9a   :  { %v327_v39 = vperm.slane %v293_v59, %v2575_v16 }
  0x9d   :  { %v271_v31 = vpop.xlane.xlu1 %270 }
  0x9e   :  { %v301_v61 = vmul.f32 %v271_v31, %v237_v22  ;;  %v231_v22 = vmul.f32 0.00390625, %v189_v35  ;;  %v2612_v35 = vpack.c.bf16 %v2507_v56, %v2505_v55  ;;  %v2654_v56 = vpack.c.bf16 %v2413_v7, %v2411_v4  ;;  %v416_v7 = vld [vmem:[%s3451_s7 + $0x10] sm:$0xff] }
  0x9f   :  { %v274_v63 = vpop.xlane.xlu2 %273 }
  0xa0   :  { %v302_v2 = vmul.f32 %v274_v63, %v238_v24  ;;  %v356_v14 = vperm.slane %v301_v61, %v2575_v16  ;;  %v2600_v24 = vadd.s32 4294967280, %v2575_v16  ;;  %v2616_v61 = vpack.c.bf16 %v2517_v13, %v2515_v10  ;;  %v417_v13 = vld [vmem:[%s3451_s7 + $0x18] sm:$0xff] }
  0xa1   :  { %v250_v3 = vpop.xlane.xlu0 %249  ;;  %v1328_v63 = vunpack.c.l.b16 %v2612_v35 }
  0xa2   :  { %v294_v34 = vmul.f32 %v250_v3, %v230_v58  ;;  %v357_v36 = vperm.slane %v302_v2, %v328_v46  ;;  %v1330_v2 = vunpack.c.l.b16 %v2616_v61  ;;  %v2623_v3 = vld [vmem:[%s3446_s2 + $0x8] sm:$0xff] }
  0xa3   :  { %1996 = vmatmul.msk.bf16.gmra.mxu3 %vm448_vm1, %v2623_v3 }
  0xa4   :  { %v329_v19 = vperm.slane %v294_v34, %v328_v46  ;;  %v2595_v41 = vsel %vm330_vm0, %v357_v36, %v356_v14  ;;  %v1338_v34 = vpack.c.b16 %v1330_v2, %v1328_v63  ;;  %v2627_v36 = vpack.c.bf16 %v2469_v6, %v2467_v5 }
  0xa5   :  { %v219_v23 = vpop.xlane.xlu1 %218  ;;  %v2639_v63 = vpack.c.bf16 %v2435_v33, %v2433_v32  ;;  %v3464_v2 = vmov 0   ;;  %v604_v32 = vld [vmem:[%s3447_s3 + $0x10] sm:$0xff] }
  0xa6   :  { %v331_v60 = vsel %vm330_vm0, %v329_v19, %v327_v39  ;;  %v2631_v39 = vpack.c.bf16 %v2487_v30, %v2485_v29  ;;  %1358 = vmatpush.bf16.msrb.mxu3 %v1338_v34  ;;  %2122 = vset.pattern.permute.xlu1 %v3464_v2  ;;  %v2647_v34 = vpack.c.bf16 %v2449_v51, %v2447_v50  ;;  %v1316_v51 = vunpack.c.l.b16 %v2654_v56 }
  0xa7   :  { %v253_v15 = vpop.xlane.xlu2 %252  ;;  %2121 = vset.pattern.permute.xlu0 %v3464_v2  ;;  %435 = vperm.xlu1 %2122, %v417_v13   ;;  %v2658_v30 = vpack.c.bf16 %v2431_v28, %v2429_v27  ;;  %v241_v28 = vmul.f32 0.00390625, %v219_v23  ;;  %v490_v23 = vld [vmem:[%s3453_s9 + $0x10] sm:$0xff] }
  0xa8   :  { %v295_v31 = vmul.f32 %v253_v15, %v231_v22  ;;  %v1326_v22 = vunpack.c.l.b16 %v2631_v39  ;;  %430 = vperm.xlu0 %2121, %v416_v7   ;;  %v415_v7 = vld [vmem:[%s3451_s7 + $0x8] sm:$0xff] }
  0xa9   :  { %v2602_v46 = vpop.xlane.xlu0 %194  ;;  %v1318_v2 = vunpack.c.l.b16 %v2658_v30 }
  0xaa   :  { %v333_v47 = vperm.slane %v295_v31, %v2600_v24 }
  0xab   :  { %v1332_v29 = vpack.c.b16 %v1318_v2, %v1316_v51  ;;  %v489_v51 = vld [vmem:[%s3453_s9 + $0x8] sm:$0xff] }
  0xac   :  { %v2606_v14 = vsel %vm334_vm2, %v333_v47, %v331_v60  ;;  %v1324_v60 = vunpack.c.l.b16 %v2627_v36 }
  0xad   :  { %v2608_v48 = vpop.xlane.xlu1 %197 }
  0xae   :  { %v1336_v47 = vpack.c.b16 %v1326_v22, %v1324_v60  ;;  %v1320_v60 = vunpack.c.l.b16 %v2639_v63  ;;  %v1322_v22 = vunpack.c.l.b16 %v2647_v34 }
  0xaf   :  { %v222_v58 = vpop.xlane.xlu2 %221 }
  0xb0   :  { %1359 = vmatpush.bf16.msrb.mxu3 %v1336_v47  ;;  %v1334_v6 = vpack.c.b16 %v1322_v22, %v1320_v60  ;;  %v414_v47 = vld [vmem:[%s3451_s7] sm:$0xff]  ;;  %503 = vperm.xlu0 %2121, %v489_v51   ;;  %v232_v51 = vmul.f32 0.00390625, %v2563_v62  ;;  %v242_v4 = vmul.f32 0.00390625, %v222_v58 }
  0xb1   :  { %v277_v59 = vpop.xlane.xlu0 %276  ;;  %420 = vperm.xlu1 %2122, %v414_v47   ;;  %v2671_v60 = vld [vmem:[%s3446_s2] sm:$0xff]  ;;  %v239_v47 = vmul.f32 0.00390625, %v2539_v40  ;;  %v344_v40 = vadd.s32 4294967256, %v2575_v16 }
  0xb3   :  { %v303_v50 = vmul.f32 %v277_v59, %v239_v47  ;;  %v233_v59 = vmul.f32 0.00390625, %v2602_v46  ;;  %v234_v47 = vmul.f32 0.00390625, %v2608_v48  ;;  %v2700_v46 = vld [vmem:[%s3446_s2 + $0x8] sm:$0xff] }
  0xb4   :  { %1360 = vmatpush.bf16.msrb.mxu3 %v1334_v6 }
  0xb5   :  { %v280_v19 = vpop.xlane.xlu1 %279 }
  0xb7   :  { %v201_v15 = vpop.xlane.xlu2 %200 }
  0xb8   :  { %1361 = vmatpush.bf16.msrb.mxu3 %v1332_v29  ;;  %v240_v29 = vmul.f32 0.00390625, %v2559_v57  ;;  %618 = vperm.xlu0 %2121, %v604_v32   ;;  %v235_v26 = vmul.f32 0.00390625, %v201_v15 }
  0xb9   :  { %v256_v31 = vpop.xlane.xlu0 %255  ;;  %425 = vperm.xlu1 %2122, %v415_v7  }
  0xba   :  { %v304_v43 = vmul.f32 %v280_v19, %v240_v29  ;;  %v296_v58 = vmul.f32 %v256_v31, %v232_v51 }
  0xbb   :  { %2045 = vmatmul.msk.bf16.vlgmr.msrb.gmra.mxu3 %vm448_vm1, %v2671_v60 }
  0xbc   :  { %v361_v62 = vperm.slane %v304_v43, %v336_v52  ;;  %v337_v48 = vperm.slane %v296_v58, %v336_v52  ;;  %v605_v52 = vld [vmem:[%s3447_s3 + $0x18] sm:$0xff] }
  0xbd   :  { %v259_v33 = vpop.xlane.xlu1 %258 }
  0xbe   :  { %v297_v25 = vmul.f32 %v259_v33, %v233_v59 }
  0xbf   :  { %v283_v13 = vpop.xlane.xlu2 %282 }
  0xc0   :  { %v305_v12 = vmul.f32 %v283_v13, %v241_v28  ;;  %v359_v28 = vperm.slane %v303_v50, %v2600_v24  ;;  %v348_v13 = vadd.s32 4294967248, %v2575_v16  ;;  %v341_v15 = vperm.slane %v297_v25, %v340_v42  ;;  %1290 = vperm.xlu0 %2121, %v604_v32   ;;  %v603_v32 = vld [vmem:[%s3447_s3 + $0x8] sm:$0xff] }
  0xc1   :  { %v225_v10 = vpop.xlane.xlu0 %224  ;;  %508 = vperm.xlu1 %2122, %v490_v23  }
  0xc2   :  { %v243_v19 = vmul.f32 0.00390625, %v225_v10  ;;  %v363_v38 = vperm.slane %v305_v12, %v340_v42  ;;  %v360_v24 = vsel %vm334_vm2, %v359_v28, %v2595_v41  ;;  %v352_v12 = vadd.s32 4294967240, %v2575_v16 }
  0xc5   :  { %v228_v22 = vpop.xlane.xlu1 %227 }
  0xc6   :  { %v244_v33 = vmul.f32 0.00390625, %v228_v22 }
  0xc7   :  { %v262_v6 = vpop.xlane.xlu2 %261 }
  0xc8   :  { %v298_v50 = vmul.f32 %v262_v6, %v234_v47 }
  0xc9   :  { %v204_v2 = vpop.xlane.xlu0 %203  ;;  %623 = vperm.xlu1 %2122, %v605_v52  }
  0xca   :  { %v345_v6 = vperm.slane %v298_v50, %v344_v40  ;;  %v236_v23 = vmul.f32 0.00390625, %v204_v2 }
  0xcb   :  { %2046 = vmatmul.msk.bf16.gmra.mxu3 %vm448_vm1, %v2700_v46 }
  0xcd   :  { %v265_v11 = vpop.xlane.xlu1 %264 }
  0xce   :  { %v299_v43 = vmul.f32 %v265_v11, %v235_v26 }
  0xcf   :  { %v289_v57 = vpop.xlane.xlu2 %288 }
  0xd0   :  { %v307_v37 = vmul.f32 %v289_v57, %v243_v19  ;;  %v349_v26 = vperm.slane %v299_v43, %v348_v13 }
  0xd1   :  { %v286_v7 = vpop.xlane.xlu0 %285  ;;  %1295 = vperm.xlu1 %2122, %v605_v52  }
  0xd2   :  { %v306_v29 = vmul.f32 %v286_v7, %v242_v4  ;;  %v362_v4 = vsel %vm338_vm3, %v361_v62, %v360_v24  ;;  %v367_v51 = vperm.slane %v307_v37, %v348_v13  ;;  %v339_v37 = vsel %vm338_vm3, %v337_v48, %v2606_v14  ;;  %v602_v14 = vld [vmem:[%s3447_s3] sm:$0xff] }
  0xd3   :  { %v364_v31 = vsel %vm342_vm4, %v363_v38, %v362_v4  ;;  %v343_v42 = vsel %vm342_vm4, %v341_v15, %v339_v37  ;;  %608 = vperm.xlu0 %2121, %v602_v14   ;;  %v3515_v4 = vmov 0  }
  0xd4   :  { %v365_v10 = vperm.slane %v306_v29, %v344_v40  ;;  %v347_v2 = vsel %vm346_vm5, %v345_v6, %v343_v42 }
  0xd5   :  { %v292_v57 = vpop.xlane.xlu1 %291  ;;  %v351_v28 = vsel %vm350_vm6, %v349_v26, %v347_v2 }
  0xd6   :  { %v366_v41 = vsel %vm346_vm5, %v365_v10, %v364_v31  ;;  %v308_v11 = vmul.f32 %v292_v57, %v244_v33 }
  0xd7   :  { %v368_v22 = vsel %vm350_vm6, %v367_v51, %v366_v41 }
  0xd8   :  { %v369_v38 = vperm.slane %v308_v11, %v352_v12 }
  0xd9   :  { %v268_v16 = vpop.xlane.xlu0 %267  ;;  %613 = vperm.xlu1 %2122, %v603_v32  }
  0xda   :  { %v300_v25 = vmul.f32 %v268_v16, %v236_v23  ;;  %v370_v59 = vsel %vm354_vm7, %v369_v38, %v368_v22  ;;  %v492_v22 = vld [vmem:[%s3453_s9 + $0x20] sm:$0xff] }
  0xdb   :  { %1280 = vperm.xlu0 %2121, %v602_v14  }
  0xdc   :  { %v353_v40 = vperm.slane %v300_v25, %v352_v12 }
  0xde   :  { %v355_v19 = vsel %vm354_vm7, %v353_v40, %v351_v28 }
  0xdf   :  { %v372_v13 = vsel %vm371_vm8, %v370_v59, %v355_v19 }
  0xe0   :  { %374 = vxpose.xlu2.b32.start.end [1/1] (short) (narrow) %v372_v13, 64 }
  0xe1   :  { %1285 = vperm.xlu1 %2122, %v603_v32  }
  0xe6   :  { %v2725_v7 = vpop.f32.mrf.mxu3 }
  0xe9   :  { %518 = vperm.xlu1 %2122, %v492_v22  }
  0xee   :  { %v2729_v62 = vpop.f32.mrf.mxu3 }
 0x119   :  { %v2727_v47 = vpop.permute.xlu1 %435 }
 0x11a   :  { %v2731_v58 = vpop.permute.xlu0 %430 }
 0x122   :  { %v2735_v10 = vpop.permute.xlu0 %503 }
 0x123   :  { %v2733_v29 = vpop.permute.xlu1 %420 }
 0x126   :  { %v715_v50 = vpop.f32.mrf.mxu3 }
 0x12a   :  { %v2742_v33 = vpop.permute.xlu0 %618 }
 0x12b   :  { %v2737_v24 = vpop.permute.xlu1 %425  ;;  %v716_v15 = vadd.f32 %v715_v50, %v2742_v33 }
 0x12d   :  { %v725_v57 = vmax.f32 %v716_v15, 0.0  ;;  %v494_v15 = vld [vmem:[%s3453_s9 + $0x30] sm:$0xff] }
 0x12e   :  { %v717_v43 = vpop.f32.mrf.mxu3  ;;  %528 = vperm.xlu1 %2122, %v494_v15  }
 0x132   :  { %v2748_v6 = vpop.permute.xlu0 %1290 }
 0x133   :  { %v2740_v48 = vpop.permute.xlu1 %508 }
 0x13b   :  { %v2745_v31 = vpop.permute.xlu1 %623 }
 0x13c   :  { %v718_v51 = vadd.f32 %v717_v43, %v2745_v31  ;;  %v491_v43 = vld [vmem:[%s3453_s9 + $0x18] sm:$0xff] }
 0x13d   :  { %513 = vperm.xlu0 %2121, %v491_v43   ;;  %v747_v43 = vld [vmem:[%s3449_s5 + $0x38] sm:$0xff] }
 0x13e   :  { %v1363_v12 = vpop.f32.mrf.mxu3  ;;  %v727_v23 = vmax.f32 %v718_v51, 0.0  ;;  %v2778_v51 = vld [vmem:[%s3448_s4] sm:$0xff] }
 0x140   :  { %v2750_v41 = vpack.c.bf16 %v727_v23, %v725_v57  ;;  %v493_v57 = vld [vmem:[%s3453_s9 + $0x28] sm:$0xff]  ;;  %v740_v23 = vld [vmem:[%s3449_s5] sm:$0xff] }
 0x141   :  { %750 = vperm.xlu1 %2122, %v740_v23  }
 0x142   :  { %2123 = vset.pattern.permute.xlu2 %v3515_v4 }
 0x143   :  { %v2752_v52 = vpop.permute.xlu1 %1295 }
 0x145   :  { %v2754_v26 = vpop.permute.xlu0 %608  ;;  %523 = vperm.xlu0 %2121, %v493_v57  }
 0x146   :  { %v1365_v11 = vpop.f32.mrf.mxu3 }
 0x14b   :  { %v2756_v37 = vpop.permute.xlu1 %613 }
 0x14d   :  { %v2759_v42 = vpop.permute.xlu0 %1280 }
 0x14e   :  { %v1368_v16 = vpop.f32.mrf.mxu3  ;;  %v1364_v59 = vadd.f32 %v1363_v12, %v2759_v42 }
 0x14f   :  { %v1369_v38 = vadd.f32 %v1368_v16, %v2748_v6  ;;  %v495_v16 = vld [vmem:[%s3453_s9 + $0x38] sm:$0xff] }
 0x150   :  { %v1392_v14 = vmax.f32 %v1364_v59, 0.0  ;;  %533 = vperm.xlu0 %2121, %v495_v16  }
 0x151   :  { %v1396_v2 = vmax.f32 %v1369_v38, 0.0  ;;  %v742_v38 = vld [vmem:[%s3449_s5 + $0x10] sm:$0xff] }
 0x152   :  { %760 = vperm.xlu1 %2122, %v742_v38  }
 0x153   :  { %v2766_v19 = vpop.permute.xlu1 %1285 }
 0x154   :  { %v1366_v13 = vadd.f32 %v1365_v11, %v2766_v19 }
 0x156   :  { %v1370_v25 = vpop.f32.mrf.mxu3  ;;  %v1394_v50 = vmax.f32 %v1366_v13, 0.0  ;;  %v746_v13 = vld [vmem:[%s3449_s5 + $0x30] sm:$0xff] }
 0x157   :  { %v1371_v40 = vadd.f32 %v1370_v25, %v2752_v52  ;;  %v2797_v25 = vld [vmem:[%s3448_s4 + $0x8] sm:$0xff] }
 0x158   :  { %v1400_v12 = vpack.c.bf16 %v1394_v50, %v1392_v14  ;;  %v2816_v14 = vld [vmem:[%s3448_s4 + $0x10] sm:$0xff]  ;;  %v745_v50 = vld [vmem:[%s3449_s5 + $0x28] sm:$0xff] }
 0x159   :  { %v1398_v28 = vmax.f32 %v1371_v40, 0.0  ;;  %v744_v40 = vld [vmem:[%s3449_s5 + $0x20] sm:$0xff] }
 0x15a   :  { %770 = vperm.xlu1 %2122, %v744_v40  }
 0x15b   :  { %v1402_v32 = vpack.c.bf16 %v1398_v28, %v1396_v2  ;;  %v741_v2 = vld [vmem:[%s3449_s5 + $0x8] sm:$0xff]  ;;  %v743_v28 = vld [vmem:[%s3449_s5 + $0x18] sm:$0xff] }
 0x15c   :  { %755 = vperm.xlu0 %2121, %v741_v2  }
 0x15d   :  { %1498 = vmatpush.bf16.msra.mxu3 %v1402_v32 }
 0x161   :  { %1499 = vmatpush.bf16.msra.mxu3 %v1400_v12  ;;  %v2829_v12 = vld [vmem:[%s3448_s4 + $0x18] sm:$0xff] }
 0x162   :  { %780 = vperm.xlu1 %2122, %v746_v13  }
 0x164   :  { %2065 = vmatmul.msk.bf16.vlgmr.msra.gmra.mxu3 %vm556_vm9, %v2778_v51  ;;  %765 = vperm.xlu0 %2121, %v743_v28  }
 0x16a   :  { %1422 = vperm.xlu1 %2122, %v740_v23  }
 0x16c   :  { %775 = vperm.xlu0 %2121, %v745_v50  }
 0x172   :  { %1432 = vperm.xlu1 %2122, %v742_v38  }
 0x174   :  { %2066 = vmatmul.msk.bf16.gmra.mxu3 %vm556_vm9, %v2797_v25  ;;  %785 = vperm.xlu0 %2121, %v747_v43  }
 0x179   :  { %v390_v11 = vpop.trf.xlu2 }
 0x17a   :  { %1442 = vperm.xlu1 %2122, %v744_v40   ;;  %v711_v40 = vadd.f32 %v2725_v7, %v2754_v26  ;;  %v644_v7 = vunpack.c.l.b16 %v2579_v20  ;;  %v2882_v20 = vld [vmem:[%s3448_s4 + $0x18] sm:$0xff] }
 0x17c   :  { %1427 = vperm.xlu0 %2121, %v741_v2   ;;  %v713_v2 = vadd.f32 %v2729_v62, %v2756_v37  ;;  %v721_v44 = vmax.f32 %v711_v40, 0.0  ;;  %v2090_v62 = vld [vmem:[%s3450_s6 + $0x8] sm:$0xff]  ;;  %v1331_v40 = vunpack.c.h.b16 %v2616_v61 }
 0x181   :  { %v391_v22 = vpop.trf.xlu2 }
 0x182   :  { %1452 = vperm.xlu1 %2122, %v746_v13   ;;  %v654_v13 = vunpack.c.l.b16 %v2557_v54 }
 0x184   :  { %2067 = vmatmul.msk.bf16.gmra.mxu3 %vm556_vm9, %v2816_v14  ;;  %1437 = vperm.xlu0 %2121, %v743_v28   ;;  %v666_v28 = vpack.c.b16 %v658_v18, %v656_v8  ;;  %v648_v18 = vunpack.c.l.b16 %v2567_v0  ;;  %v650_v8 = vunpack.c.l.b16 %v2571_v1  ;;  %v2861_v0 = vld [vmem:[%s3448_s4] sm:$0xff]  ;;  %v2868_v1 = vld [vmem:[%s3448_s4 + $0x8] sm:$0xff] }
 0x186   :  { %v662_v54 = vpack.c.b16 %v650_v8, %v648_v18  ;;  %v488_v18 = vld [vmem:[%s3453_s9] sm:$0xff] }
 0x187   :  { %498 = vperm.xlu2 %2123, %v488_v18  }
 0x189   :  { %v392_v59 = vpop.trf.xlu2 }
 0x18c   :  { %1447 = vperm.xlu0 %2121, %v745_v50   ;;  %v406_v50 = vpack.c.bf16 %v391_v22, %v390_v11  ;;  %v646_v11 = vunpack.c.l.b16 %v2583_v21 }
 0x18e   :  { %v660_v22 = vpack.c.b16 %v646_v11, %v644_v7 }
 0x191   :  { %v393_v32 = vpop.trf.xlu2 }
 0x192   :  { %v407_v17 = vpack.c.bf16 %v393_v32, %v392_v59 }
 0x194   :  { %2068 = vmatmul.msk.bf16.gmra.mxu3 %vm556_vm9, %v2829_v12  ;;  %1457 = vperm.xlu0 %2121, %v747_v43  }
 0x199   :  { %v394_v15 = vpop.trf.xlu2 }
 0x1a1   :  { %v395_v57 = vpop.trf.xlu2 }
 0x1a2   :  { %v408_v38 = vpack.c.bf16 %v395_v57, %v394_v15  ;;  %v723_v15 = vmax.f32 %v713_v2, 0.0  ;;  %v1329_v2 = vunpack.c.h.b16 %v2612_v35  ;;  %v2093_v35 = vld [vmem:[%s3452_s8 + $0x10] sm:$0xff] }
 0x1a9   :  { %v396_v16 = vpop.trf.xlu2 }
 0x1b1   :  { %v397_v23 = vpop.trf.xlu2 }
 0x1b2   :  { %v409_v9 = vpack.c.bf16 %v397_v23, %v396_v16 }
 0x1b4   :  { %459 = vmatpush.bf16.msra.mxu0 %v409_v9  ;;  %2107 = vmatpush.bf16.msra.mxu2 %v409_v9  ;;  %v652_v9 = vunpack.c.l.b16 %v2553_v49  ;;  %v729_v49 = vpack.c.bf16 %v723_v15, %v721_v44  ;;  %v1325_v15 = vunpack.c.h.b16 %v2627_v36  ;;  %v1321_v44 = vunpack.c.h.b16 %v2639_v63 }
 0x1b8   :  { %460 = vmatpush.bf16.msra.mxu0 %v408_v38  ;;  %2108 = vmatpush.bf16.msra.mxu2 %v408_v38 }
 0x1bc   :  { %461 = vmatpush.bf16.msra.mxu0 %v407_v17  ;;  %2109 = vmatpush.bf16.msra.mxu2 %v407_v17  ;;  %v664_v17 = vpack.c.b16 %v654_v13, %v652_v9 }
 0x1c0   :  { %462 = vmatpush.bf16.msra.mxu0 %v406_v50  ;;  %2110 = vmatpush.bf16.msra.mxu2 %v406_v50 }
 0x1c3   :  { %1963 = vmatmul.msk.bf16.vlgmr.msra.gmra.mxu0 %vm448_vm1, %v2089_v45  ;;  %1964 = vmatmul.msk.bf16.vlgmr.msra.gmra.mxu2 %vm448_vm1, %v2090_v62  ;;  %v1323_v45 = vunpack.c.h.b16 %v2647_v34  ;;  %v1317_v62 = vunpack.c.h.b16 %v2654_v56  ;;  %v2092_v34 = vld [vmem:[%s3452_s8 + $0x8] sm:$0xff] }
 0x1c4   :  { %686 = vmatpush.bf16.msrb.mxu2 %v666_v28 }
 0x1c8   :  { %687 = vmatpush.bf16.msrb.mxu2 %v664_v17  ;;  %v1319_v17 = vunpack.c.h.b16 %v2658_v30 }
 0x1ca   :  { %v1333_v63 = vpack.c.b16 %v1319_v17, %v1317_v62 }
 0x1cc   :  { %688 = vmatpush.bf16.msrb.mxu2 %v662_v54 }
 0x1d0   :  { %689 = vmatpush.bf16.msrb.mxu2 %v660_v22 }
 0x1d3   :  { %1993 = vmatmul.msk.bf16.vlgmr.msrb.gmra.mxu2 %vm448_vm1, %v2593_v53  ;;  %v2875_v53 = vld [vmem:[%s3448_s4 + $0x10] sm:$0xff] }
 0x1d4   :  { %855 = vmatpush.bf16.msra.mxu2 %v2750_v41 }
 0x1d8   :  { %856 = vmatpush.bf16.msra.mxu2 %v729_v49  ;;  %v2094_v49 = vld [vmem:[%s3452_s8 + $0x18] sm:$0xff] }
 0x1e3   :  { %1994 = vmatmul.msk.bf16.gmra.mxu2 %vm448_vm1, %v2623_v3 }
 0x1f3   :  { %2017 = vmatmul.msk.bf16.vlgmr.msra.gmra.mxu2 %vm556_vm9, %v2861_v0 }
 0x203   :  { %2018 = vmatmul.msk.bf16.gmra.mxu2 %vm556_vm9, %v2868_v1 }
 0x213   :  { %2019 = vmatmul.msk.bf16.gmra.mxu2 %vm556_vm9, %v2875_v53 }
 0x223   :  { %2020 = vmatmul.msk.bf16.gmra.mxu2 %vm556_vm9, %v2882_v20 }
 0x240   :  { %v464_v21 = vpop.f32.mrf.mxu0 }
 0x241   :  { %v465_v16 = vadd.f32 %v464_v21, %v2733_v29  ;;  %v2091_v29 = vld [vmem:[%s3452_s8] sm:$0xff]  ;;  %s2343_s8 = smov [#allocation7]  }
 0x242   :  { %s1939_s9 = sshll.u32 %s2343_s8, 4  ;;  %s1940_s9 = int_to_ptr.vmem [resolvable:$true] %s1939_s9 }
 0x243   :  { %v474_v13 = vmax.f32 %v465_v16, 0.0 }
 0x246   :  { %v469_v3 = vpop.f32.mrf.mxu2 }
 0x247   :  { %v470_v59 = vadd.f32 %v469_v3, %v2731_v58  ;;  %v1339_v58 = vpack.c.b16 %v1331_v40, %v1329_v2 }
 0x248   :  { %v466_v41 = vpop.f32.mrf.mxu0 }
 0x249   :  { %v467_v43 = vadd.f32 %v466_v41, %v2737_v24  ;;  %v476_v23 = vmax.f32 %v470_v59, 0.0  ;;  %v1327_v24 = vunpack.c.h.b16 %v2631_v39  ;;  %v1335_v39 = vpack.c.b16 %v1323_v45, %v1321_v44 }
 0x24b   :  { %v475_v28 = vmax.f32 %v467_v43, 0.0  ;;  %v1337_v61 = vpack.c.b16 %v1327_v24, %v1325_v15 }
 0x24e   :  { %v471_v32 = vpop.f32.mrf.mxu2 }
 0x24f   :  { %v472_v57 = vadd.f32 %v471_v32, %v2727_v47  ;;  %v478_v47 = vpack.c.bf16 %v475_v28, %v474_v13 }
 0x251   :  { %v477_v38 = vmax.f32 %v472_v57, 0.0 }
 0x253   :  { %v479_v9 = vpack.c.bf16 %v477_v38, %v476_v23 }
 0x255   :  { %575 = vmatpush.bf16.msrb.mxu0 %v479_v9  ;;  %2111 = vmatpush.bf16.msra.mxu1 %v479_v9 }
 0x256   :  { %v691_v50 = vpop.f32.mrf.mxu2 }
 0x257   :  { %v692_v11 = vadd.f32 %v691_v50, %v2754_v26  ;;  %v519_v26 = vpop.permute.xlu1 %518 }
 0x259   :  { %576 = vmatpush.bf16.msrb.mxu0 %v478_v47  ;;  %2112 = vmatpush.bf16.msra.mxu1 %v478_v47  ;;  %v720_v59 = vmax.f32 %v692_v11, 0.0 }
 0x25c   :  { %1981 = vmatmul.msk.bf16.vlgmr.msrb.gmra.mxu0 %vm556_vm9, %v2091_v29  ;;  %1983 = vmatmul.msk.bf16.vlgmr.msra.gmra.mxu1 %vm556_vm9, %v2093_v35 }
 0x25d   :  { %1377 = vmatpush.bf16.msrb.mxu1 %v1339_v58 }
 0x25e   :  { %v693_v36 = vpop.f32.mrf.mxu2 }
 0x25f   :  { %v694_v54 = vadd.f32 %v693_v36, %v2756_v37 }
 0x261   :  { %1378 = vmatpush.bf16.msrb.mxu1 %v1337_v61  ;;  %v722_v3 = vmax.f32 %v694_v54, 0.0 }
 0x263   :  { %v728_v32 = vpack.c.bf16 %v722_v3, %v720_v59 }
 0x265   :  { %1379 = vmatpush.bf16.msrb.mxu1 %v1335_v39 }
 0x266   :  { %v696_v8 = vpop.f32.mrf.mxu2 }
 0x267   :  { %v697_v30 = vadd.f32 %v696_v8, %v2742_v33  ;;  %v2342_v33 = vmov 1  }
 0x268   :  { %2125 = vset.pattern.permute.xlu2 %v2342_v33 }
 0x269   :  { %1380 = vmatpush.bf16.msrb.mxu1 %v1333_v63  ;;  %v724_v22 = vmax.f32 %v697_v30, 0.0 }
 0x26c   :  { %1982 = vmatmul.msk.bf16.gmra.mxu0 %vm556_vm9, %v2092_v34  ;;  %1984 = vmatmul.msk.bf16.gmra.mxu1 %vm556_vm9, %v2094_v49 }
 0x26e   :  { %v698_v56 = vpop.f32.mrf.mxu2 }
 0x26f   :  { %v699_v7 = vadd.f32 %v698_v56, %v2745_v31  ;;  %v499_v31 = vpop.permute.xlu2 %498 }
 0x271   :  { %v726_v21 = vmax.f32 %v699_v7, 0.0 }
 0x273   :  { %v730_v41 = vpack.c.bf16 %v726_v21, %v724_v22 }
 0x275   :  { %826 = vmatpush.bf16.msra.mxu0 %v730_v41 }
 0x276   :  { %v858_v54 = vpop.f32.mrf.mxu2 }
 0x279   :  { %827 = vmatpush.bf16.msra.mxu0 %v728_v32 }
 0x27c   :  { %2013 = vmatmul.msk.bf16.vlgmr.msra.gmra.mxu0 %vm556_vm9, %v2861_v0  ;;  %2047 = vmatmul.msk.bf16.vlgmr.msrb.gmra.mxu1 %vm448_vm1, %v2671_v60 }
 0x27e   :  { %v2963_v11 = vpop.f32.mrf.mxu2 }
 0x286   :  { %v2973_v59 = vpop.f32.mrf.mxu2 }
 0x28c   :  { %2014 = vmatmul.msk.bf16.gmra.mxu0 %vm556_vm9, %v2868_v1  ;;  %2048 = vmatmul.msk.bf16.gmra.mxu1 %vm448_vm1, %v2700_v46  ;;  %v514_v1 = vpop.permute.xlu0 %513 }
 0x294   :  { %v524_v23 = vpop.permute.xlu0 %523 }
 0x29c   :  { %2015 = vmatmul.msk.bf16.gmra.mxu0 %vm556_vm9, %v2875_v53  ;;  %v529_v53 = vpop.permute.xlu1 %528  ;;  %v534_v15 = vpop.permute.xlu0 %533 }
 0x2a4   :  { %v2943_v35 = vpop.permute.xlu0 %755 }
 0x2ac   :  { %2016 = vmatmul.msk.bf16.gmra.mxu0 %vm556_vm9, %v2882_v20  ;;  %v2950_v17 = vpop.permute.xlu0 %765 }
 0x2d9   :  { %v578_v37 = vpop.f32.mrf.mxu0  ;;  %v588_v0 = vpop.f32.mrf.mxu1 }
 0x2da   :  { %v579_v43 = vadd.f32 %v578_v37, %v499_v31  ;;  %v589_v60 = vadd.f32 %v588_v0, %v519_v26  ;;  %v2986_v0 = vpop.f32.mrf.mxu2 }
 0x2dc   :  { %1567 = vperm.xlu2 %2125, %v589_v60   ;;  %880 = vperm.xlu1 %2122, %v579_v43  }
 0x2e1   :  { %v580_v57 = vpop.f32.mrf.mxu0  ;;  %v590_v16 = vpop.f32.mrf.mxu1 }
 0x2e2   :  { %v581_v46 = vadd.f32 %v580_v57, %v2735_v10  ;;  %v591_v2 = vadd.f32 %v590_v16, %v524_v23  ;;  %v2936_v10 = vpop.permute.xlu1 %750  ;;  %v868_v23 = vpop.f32.mrf.mxu2 }
 0x2e4   :  { %900 = vperm.xlu1 %2122, %v589_v60   ;;  %1555 = vperm.xlu2 %2125, %v581_v46  }
 0x2e5   :  { %885 = vperm.xlu0 %2121, %v581_v46  }
 0x2e9   :  { %v593_v20 = vpop.f32.mrf.mxu1  ;;  %v583_v40 = vpop.f32.mrf.mxu0 }
 0x2ea   :  { %v594_v38 = vadd.f32 %v593_v20, %v529_v53  ;;  %v584_v9 = vadd.f32 %v583_v40, %v2740_v48  ;;  %v2939_v47 = vpop.permute.xlu1 %760  ;;  %v2941_v48 = vpop.f32.mrf.mxu3 }
 0x2ec   :  { %2124 = vset.pattern.permute.xlu1 %v2342_v33  ;;  %1575 = vperm.xlu2 %2125, %v594_v38  }
 0x2ed   :  { %905 = vperm.xlu0 %2121, %v591_v2   ;;  %1551 = vperm.xlu1 %2124, %v579_v43  }
 0x2f1   :  { %v595_v28 = vpop.f32.mrf.mxu1  ;;  %v585_v50 = vpop.f32.mrf.mxu0 }
 0x2f2   :  { %v586_v58 = vadd.f32 %v585_v50, %v514_v1  ;;  %v596_v29 = vadd.f32 %v595_v28, %v534_v15  ;;  %v2945_v44 = vpop.permute.xlu1 %770 }
 0x2f5   :  { %2127 = vset.pattern.permute.xlu0 %v2342_v33  ;;  %2126 = vset.pattern.permute.xlu1 %v3515_v4 }
 0x2f6   :  { %1559 = vperm.xlu0 %2127, %v584_v9   ;;  %890 = vperm.xlu1 %2126, %v584_v9  }
 0x2f9   :  { %v1382_v13 = vpop.f32.mrf.mxu1 }
 0x2fa   :  { %v1383_v18 = vadd.f32 %v1382_v13, %v2759_v42  ;;  %v2953_v34 = vpop.permute.xlu1 %780 }
 0x2fc   :  { %v1393_v56 = vmax.f32 %v1383_v18, 0.0 }
 0x2fe   :  { %2128 = vset.pattern.permute.xlu0 %v3515_v4  ;;  %910 = vperm.xlu1 %2126, %v594_v38   ;;  %v1503_v4 = vpop.f32.mrf.mxu3 }
 0x2ff   :  { %895 = vperm.xlu0 %2128, %v586_v58  }
 0x301   :  { %v1384_v24 = vpop.f32.mrf.mxu1 }
 0x302   :  { %v1385_v39 = vadd.f32 %v1384_v24, %v2766_v19  ;;  %v2957_v19 = vpop.permute.xlu0 %775  ;;  %v2961_v42 = vpop.permute.xlu1 %1422 }
 0x304   :  { %v1395_v49 = vmax.f32 %v1385_v39, 0.0 }
 0x306   :  { %2129 = vset.pattern.permute.xlu1 %v2342_v33  ;;  %v1401_v7 = vpack.c.bf16 %v1395_v49, %v1393_v56 }
 0x307   :  { %915 = vperm.xlu0 %2128, %v596_v29   ;;  %1563 = vperm.xlu1 %2129, %v586_v58  }
 0x309   :  { %v1387_v61 = vpop.f32.mrf.mxu1 }
 0x30a   :  { %v1388_v45 = vadd.f32 %v1387_v61, %v2748_v6  ;;  %v2955_v6 = vpop.f32.mrf.mxu3  ;;  %v2967_v21 = vpop.permute.xlu0 %785 }
 0x30b   :  { %v2971_v41 = vpop.permute.xlu1 %1432 }
 0x30c   :  { %v1397_v63 = vmax.f32 %v1388_v45, 0.0 }
 0x30f   :  { %2130 = vset.pattern.permute.xlu0 %v2342_v33  ;;  %1571 = vperm.xlu1 %2129, %v591_v2  }
 0x310   :  { %1579 = vperm.xlu0 %2130, %v596_v29  }
 0x311   :  { %v1389_v36 = vpop.f32.mrf.mxu1 }
 0x312   :  { %v1390_v62 = vadd.f32 %v1389_v36, %v2752_v52  ;;  %v829_v52 = vpop.f32.mrf.mxu0  ;;  %v2965_v22 = vpop.f32.mrf.mxu3  ;;  %v859_v36 = vadd.f32 %v858_v54, %v2936_v10 }
 0x313   :  { %v2977_v33 = vpop.permute.xlu0 %1427  ;;  %v2981_v31 = vpop.permute.xlu1 %1442  ;;  %v830_v39 = vadd.f32 %v829_v52, %v2936_v10 }
 0x314   :  { %v1399_v8 = vmax.f32 %v1390_v62, 0.0 }
 0x316   :  { %v1403_v30 = vpack.c.bf16 %v1399_v8, %v1397_v63 }
 0x318   :  { %1527 = vmatpush.bf16.msra.mxu1 %v1403_v30 }
 0x31a   :  { %v2969_v3 = vpop.f32.mrf.mxu0  ;;  %v1511_v32 = vpop.f32.mrf.mxu3 }
 0x31b   :  { %v1512_v26 = vadd.f32 %v1511_v32, %v2981_v31  ;;  %v2991_v57 = vpop.permute.xlu0 %1437  ;;  %v3001_v2 = vpop.permute.xlu1 %1452  ;;  %v3020_v32 = vadd.f32 %v2941_v48, %v2961_v42 }
 0x31c   :  { %1528 = vmatpush.bf16.msra.mxu1 %v1401_v7 }
 0x31f   :  { %2069 = vmatmul.msk.bf16.vlgmr.msra.gmra.mxu1 %vm556_vm9, %v2778_v51 }
 0x322   :  { %v2979_v51 = vpop.f32.mrf.mxu0  ;;  %v2989_v60 = vpop.f32.mrf.mxu3 }
 0x323   :  { %v3004_v13 = vpop.permute.xlu0 %1447 }
 0x32a   :  { %v2994_v16 = vpop.f32.mrf.mxu0  ;;  %v1516_v40 = vpop.f32.mrf.mxu3 }
 0x32b   :  { %v1517_v9 = vadd.f32 %v1516_v40, %v3001_v2  ;;  %v3014_v49 = vpop.permute.xlu0 %1457  ;;  %v3035_v40 = vadd.f32 %v2973_v59, %v2939_v47  ;;  %v832_v59 = vadd.f32 %v2969_v3, %v2943_v35 }
 0x32f   :  { %2070 = vmatmul.msk.bf16.gmra.mxu1 %vm556_vm9, %v2797_v25  ;;  %v1504_v25 = vadd.f32 %v1503_v4, %v2977_v33  ;;  %v870_v4 = vpop.f32.mrf.mxu2 }
 0x332   :  { %v839_v58 = vpop.f32.mrf.mxu0 }
 0x336   :  { %v2984_v37 = vpop.permute.xlu2 %1567 }
 0x337   :  { %v1590_v43 = vadd.f32 %v2984_v37, %v1512_v26 }
 0x339   :  { %v2081_v1 = vmul.f32 -1.442695, %v1590_v43 }
 0x33a   :  { %v3022_v26 = vpop.f32.mrf.mxu0 }
 0x33b   :  { %2131 = vpow2.f32 %v2081_v1 }
 0x33e   :  { %v2996_v46 = vpop.permute.xlu2 %1555 }
 0x33f   :  { %v1584_v53 = vadd.f32 %v2996_v46, %v1504_v25  ;;  %2071 = vmatmul.msk.bf16.gmra.mxu1 %vm556_vm9, %v2816_v14  ;;  %v3026_v25 = vadd.f32 %v2955_v6, %v2971_v41 }
 0x341   :  { %v2132_v20 = vpop.eup %2131  ;;  %v2075_v38 = vmul.f32 -1.442695, %v1584_v53  ;;  %v861_v53 = vadd.f32 %v2963_v11, %v2943_v35  ;;  %v840_v11 = vadd.f32 %v839_v58, %v2945_v44 }
 0x342   :  { %v1654_v28 = vadd.f32 1.0, %v2132_v20 }
 0x343   :  { %2133 = vpow2.f32 %v2075_v38 }
 0x344   :  { %2135 = vrcp.f32 %v1654_v28  ;;  %v1791_v18 = vand.u32 2147483647, %v1654_v28  ;;  %v1793_v63 = vand.u32 2147483648, %v1654_v28  ;;  %vm1787_vm11 = vweird.f32 %v1654_v28 }
 0x346   :  { %v3006_v50 = vpop.permute.xlu2 %1575  ;;  %vm1792_vm13 = vcmp.eq.f32.partialorder %v1791_v18, 8.507059e+37 }
 0x347   :  { %v1594_v15 = vadd.f32 %v3006_v50, %v1517_v9  ;;  %v873_v9 = vpop.f32.mrf.mxu2 }
 0x349   :  { %v2134_v24 = vpop.eup %2133  ;;  %v2085_v14 = vmul.f32 -1.442695, %v1594_v15 }
 0x34a   :  { %v2136_v29 = vpop.eup %2135  ;;  %v3009_v61 = vadd.f32 1.0, %v2134_v24 }
 0x34b   :  { %v1783_v45 = vmul.f32 %v2136_v29, %v1654_v28  ;;  %2137 = vpow2.f32 %v2085_v14  ;;  %vm1788_vm10 = vweird.f32 %v2136_v29  ;;  %v869_v28 = vadd.f32 %v868_v23, %v2945_v44 }
 0x34c   :  { %2139 = vrcp.f32 %v3009_v61  ;;  %vm1789_vm12 = vmor %vm1787_vm11, %vm1788_vm10  ;;  %v3043_v14 = vadd.f32 %v2986_v0, %v2950_v17  ;;  %v1703_v23 = vand.u32 2147483648, %v3009_v61  ;;  %v3055_v0 = vadd.f32 %v2979_v51, %v2939_v47 }
 0x34d   :  { %v1784_v62 = vsub.f32 1.0, %v1783_v45  ;;  %vm1697_vm15 = vweird.f32 %v3009_v61 }
 0x34e   :  { %v881_v8 = vpop.permute.xlu1 %880 }
 0x34f   :  { %v1785_v30 = vmul.f32 %v2136_v29, %v1784_v62  ;;  %v918_v56 = vadd.f32 %v881_v8, %v830_v39  ;;  %v919_v7 = vadd.f32 %v881_v8, %v859_v36  ;;  %2072 = vmatmul.msk.bf16.gmra.mxu1 %vm556_vm9, %v2829_v12  ;;  %v1794_v12 = vor.u32 1.1754944e-38, %v1793_v63 }
 0x350   :  { %v871_v39 = vadd.f32 %v870_v4, %v2957_v19  ;;  %v3051_v62 = vadd.f32 %v873_v9, %v2953_v34 }
 0x351   :  { %v2138_v54 = vpop.eup %2137  ;;  %v1786_v10 = vadd.f32 %v2136_v29, %v1785_v30  ;;  %v2021_v52 = vmul.f32 -1.442695, %v918_v56  ;;  %v2022_v43 = vmul.f32 -1.442695, %v919_v7  ;;  %v1704_v56 = vor.u32 1.1754944e-38, %v1703_v23 }
 0x352   :  { %v2140_v1 = vpop.eup %2139  ;;  %v3030_v20 = vadd.f32 1.0, %v2138_v54 }
 0x353   :  { %v1790_v48 = vsel %vm1789_vm12, %v2136_v29, %v1786_v10  ;;  %v1693_v38 = vmul.f32 %v2140_v1, %v3009_v61  ;;  %2141 = vpow2.f32 %v2021_v52  ;;  %v1701_v29 = vand.u32 2147483647, %v3009_v61  ;;  %v844_v10 = vpop.f32.mrf.mxu0 }
 0x354   :  { %v1795_v6 = vsel %vm1792_vm13, %v1794_v12, %v1790_v48  ;;  %2143 = vrcp.f32 %v3030_v20  ;;  %vm1698_vm14 = vweird.f32 %v2140_v1  ;;  %v1851_v4 = vand.u32 2147483647, %v3030_v20 }
 0x355   :  { %v1910_v15 = vmul.f32 %v1795_v6, %v2467_v5  ;;  %v1694_v24 = vsub.f32 1.0, %v1693_v38  ;;  %2145 = vpow2.f32 %v2022_v43  ;;  %vm1699_vm0 = vmor %vm1697_vm15, %vm1698_vm14  ;;  %vm1702_vm1 = vcmp.eq.f32.partialorder %v1701_v29, 8.507059e+37 }
 0x356   :  { %v901_v45 = vpop.permute.xlu1 %900  ;;  %v1853_v38 = vand.u32 2147483648, %v3030_v20  ;;  %v3069_v6 = vadd.f32 %v2994_v16, %v2950_v17  ;;  %v3074_v9 = vadd.f32 %v844_v10, %v2953_v34  ;;  %vm1847_vm2 = vweird.f32 %v3030_v20 }
 0x357   :  { %1927 = vst [vmem:[#allocation7 + $0xc0] sm:$0xff] %v1910_v15  ;;  %v1695_v36 = vmul.f32 %v2140_v1, %v1694_v24  ;;  %v926_v44 = vadd.f32 %v901_v45, %v840_v11  ;;  %v927_v58 = vadd.f32 %v901_v45, %v869_v28  ;;  %v886_v5 = vpop.permute.xlu0 %885  ;;  %vm3078_vm4 = vcmp.eq.f32.partialorder %v1851_v4, 8.507059e+37 }
 0x358   :  { %v920_v35 = vadd.f32 %v886_v5, %v832_v59  ;;  %v921_v8 = vadd.f32 %v886_v5, %v861_v53 }
 0x359   :  { %v2142_v3 = vpop.eup %2141  ;;  %v1696_v18 = vadd.f32 %v2140_v1, %v1695_v36  ;;  %v2029_v63 = vmul.f32 -1.442695, %v926_v44  ;;  %v2030_v51 = vmul.f32 -1.442695, %v927_v58 }
 0x35a   :  { %v2144_v30 = vpop.eup %2143  ;;  %v3059_v7 = vadd.f32 1.0, %v2142_v3  ;;  %v2023_v61 = vmul.f32 -1.442695, %v920_v35  ;;  %v2024_v28 = vmul.f32 -1.442695, %v921_v8 }
 0x35b   :  { %v2146_v54 = vpop.eup %2145  ;;  %v1700_v52 = vsel %vm1699_vm0, %v2140_v1, %v1696_v18  ;;  %v1843_v47 = vmul.f32 %v2144_v30, %v3030_v20  ;;  %2147 = vpow2.f32 %v2029_v63  ;;  %v842_v1 = vadd.f32 %v3022_v26, %v2957_v19 }
 0x35c   :  { %v1705_v43 = vsel %vm1702_vm1, %v1704_v56, %v1700_v52  ;;  %v3062_v12 = vadd.f32 1.0, %v2146_v54  ;;  %2149 = vrcp.f32 %v3059_v7  ;;  %vm1848_vm3 = vweird.f32 %v2144_v30 }
 0x35d   :  { %v1904_v53 = vmul.f32 %v1705_v43, %v2429_v27  ;;  %v1844_v48 = vsub.f32 1.0, %v1843_v47  ;;  %v1007_v17 = vand.u32 2147483647, %v3059_v7  ;;  %v1854_v26 = vor.u32 1.1754944e-38, %v1853_v38  ;;  %vm1849_vm5 = vmor %vm1847_vm2, %vm1848_vm3 }
 0x35e   :  { %2151 = vrcp.f32 %v3062_v12  ;;  %vm1003_vm6 = vweird.f32 %v3059_v7  ;;  %v1009_v20 = vand.u32 2147483648, %v3059_v7  ;;  %v1022_v29 = vand.u32 2147483647, %v3062_v12 }
 0x35f   :  { %1921 = vst [vmem:[#allocation7 + $0x90] sm:$0xff] %v1904_v53  ;;  %v1845_v11 = vmul.f32 %v2144_v30, %v1844_v48  ;;  %2153 = vpow2.f32 %v2030_v51  ;;  %v906_v27 = vpop.permute.xlu0 %905  ;;  %vm1018_vm7 = vweird.f32 %v3062_v12  ;;  %vm3092_vm8 = vcmp.eq.f32.partialorder %v1007_v17, 8.507059e+37  ;;  %v3100_v56 = vpop.permute.xlu1 %1551 }
 0x360   :  { %2155 = vpow2.f32 %v2023_v61  ;;  %v928_v19 = vadd.f32 %v906_v27, %v842_v1  ;;  %v929_v24 = vadd.f32 %v906_v27, %v871_v39  ;;  %v1024_v35 = vand.u32 2147483648, %v3062_v12 }
 0x361   :  { %v2148_v16 = vpop.eup %2147  ;;  %v1846_v34 = vadd.f32 %v2144_v30, %v1845_v11  ;;  %2157 = vpow2.f32 %v2024_v28  ;;  %v1010_v54 = vor.u32 1.1754944e-38, %v1009_v20  ;;  %vm3102_vm10 = vcmp.eq.f32.partialorder %v1022_v29, 8.507059e+37  ;;  %v3522_v20 = vld [vmem:[#allocation15_spill] sm:$0xff] }
 0x362   :  { %v2150_v59 = vpop.eup %2149  ;;  %v3086_v23 = vadd.f32 1.0, %v2148_v16  ;;  %v2031_v44 = vmul.f32 -1.442695, %v928_v19  ;;  %v1025_v61 = vor.u32 1.1754944e-38, %v1024_v35  ;;  %v3113_v53 = vadd.f32 %v3100_v56, %v3020_v32 }
 0x363   :  { %v1850_v45 = vsel %vm1849_vm5, %v2144_v30, %v1846_v34  ;;  %v999_v36 = vmul.f32 %v2150_v59, %v3059_v7  ;;  %v2032_v30 = vmul.f32 -1.442695, %v929_v24  ;;  %vm1004_vm9 = vweird.f32 %v2150_v59 }
 0x364   :  { %v2152_v58 = vpop.eup %2151  ;;  %v1855_v5 = vsel %vm3078_vm4, %v1854_v26, %v1850_v45  ;;  %2159 = vrcp.f32 %v3086_v23  ;;  %vm1005_vm12 = vmor %vm1003_vm6, %vm1004_vm9  ;;  %vm1123_vm13 = vweird.f32 %v3086_v23  ;;  %v1127_v11 = vand.u32 2147483647, %v3086_v23 }
 0x365   :  { %v2154_v3 = vpop.eup %2153  ;;  %v1914_v18 = vmul.f32 %v1855_v5, %v2505_v55  ;;  %v1000_v63 = vsub.f32 1.0, %v999_v36  ;;  %v1014_v8 = vmul.f32 %v2152_v58, %v3062_v12  ;;  %2161 = vpow2.f32 %v2031_v44 }
 0x366   :  { %v2156_v4 = vpop.eup %2155  ;;  %v3106_v52 = vadd.f32 1.0, %v2154_v3  ;;  %vm1019_vm11 = vweird.f32 %v2152_v58  ;;  %v1129_v27 = vand.u32 2147483648, %v3086_v23  ;;  %vm3140_vm15 = vcmp.eq.f32.partialorder %v1127_v11, 8.507059e+37 }
 0x367   :  { %v2158_v47 = vpop.eup %2157  ;;  %1931 = vst [vmem:[#allocation7 + $0xe0] sm:$0xff] %v1914_v18  ;;  %v1001_v51 = vmul.f32 %v2150_v59, %v1000_v63  ;;  %v1015_v43 = vsub.f32 1.0, %v1014_v8  ;;  %v3108_v55 = vadd.f32 1.0, %v2156_v4  ;;  %vm1020_vm14 = vmor %vm1018_vm7, %vm1019_vm11 }
 0x368   :  { %2163 = vrcp.f32 %v3106_v52  ;;  %v3115_v28 = vadd.f32 1.0, %v2158_v47  ;;  %v1142_v19 = vand.u32 2147483647, %v3106_v52  ;;  %v1144_v7 = vand.u32 2147483648, %v3106_v52  ;;  %v3136_v36 = vpop.permute.xlu0 %1559  ;;  %v3147_v8 = vpop.permute.xlu1 %890 }
 0x369   :  { %v1002_v48 = vadd.f32 %v2150_v59, %v1001_v51  ;;  %v1016_v38 = vmul.f32 %v2152_v58, %v1015_v43  ;;  %2165 = vpow2.f32 %v2032_v30  ;;  %v1037_v34 = vand.u32 2147483647, %v3108_v55 }
 0x36a   :  { %v2160_v1 = vpop.eup %2159  ;;  %2167 = vrcp.f32 %v3108_v55  ;;  %v1039_v26 = vand.u32 2147483648, %v3108_v55  ;;  %v1130_v39 = vor.u32 1.1754944e-38, %v1129_v27  ;;  %vm1138_vm0 = vweird.f32 %v3106_v52 }
 0x36b   :  { %v1006_v32 = vsel %vm1005_vm12, %v2150_v59, %v1002_v48  ;;  %v1017_v15 = vadd.f32 %v2152_v58, %v1016_v38  ;;  %v1119_v17 = vmul.f32 %v2160_v1, %v3086_v23  ;;  %v2162_v24 = vpop.eup %2161  ;;  %2169 = vrcp.f32 %v3115_v28 }
 0x36c   :  { %v1011_v16 = vsel %vm3092_vm8, %v1010_v54, %v1006_v32  ;;  %vm1124_vm1 = vweird.f32 %v2160_v1  ;;  %vm3149_vm2 = vcmp.eq.f32.partialorder %v1142_v19, 8.507059e+37  ;;  %v1145_v54 = vor.u32 1.1754944e-38, %v1144_v7 }
 0x36d   :  { %v1021_v59 = vsel %vm1020_vm14, %v2152_v58, %v1017_v15  ;;  %v1238_v29 = vmul.f32 %v1011_v16, %v3522_v20  ;;  %v1120_v45 = vsub.f32 1.0, %v1119_v17  ;;  %v3525_v58 = vld [vmem:[#allocation16_spill] sm:$0xff]  ;;  %vm1033_vm3 = vweird.f32 %v3108_v55  ;;  %vm1125_vm5 = vmor %vm1123_vm13, %vm1124_vm1 }
 0x36e   :  { %v2164_v44 = vpop.eup %2163  ;;  %v1026_v12 = vsel %vm3102_vm10, %v1025_v61, %v1021_v59  ;;  %v3154_v10 = vadd.f32 1.0, %v2162_v24  ;;  %vm3157_vm4 = vcmp.eq.f32.partialorder %v1037_v34, 8.507059e+37  ;;  %v1040_v48 = vor.u32 1.1754944e-38, %v1039_v26  ;;  %v3530_v26 = vld [vmem:[#allocation27_spill] sm:$0xff] }
 0x36f   :  { %v2166_v35 = vpop.eup %2165  ;;  %v1239_v3 = vmul.f32 %v1026_v12, %v3525_v58  ;;  %1254 = vst [vmem:[#allocation7] sm:$0xff] %v1238_v29  ;;  %v1121_v18 = vmul.f32 %v2160_v1, %v1120_v45  ;;  %v1134_v63 = vmul.f32 %v2164_v44, %v3106_v52  ;;  %vm1048_vm6 = vweird.f32 %v3115_v28 }
 0x370   :  { %v2168_v30 = vpop.eup %2167  ;;  %v1052_v38 = vand.u32 2147483647, %v3115_v28  ;;  %v1054_v11 = vand.u32 2147483648, %v3115_v28  ;;  %v3166_v27 = vadd.f32 1.0, %v2166_v35  ;;  %2171 = vrcp.f32 %v3154_v10 }
 0x371   :  { %1255 = vst [vmem:[#allocation7 + $0x8] sm:$0xff] %v1239_v3  ;;  %v1122_v47 = vadd.f32 %v2160_v1, %v1121_v18  ;;  %v1135_v51 = vsub.f32 1.0, %v1134_v63  ;;  %v1029_v43 = vmul.f32 %v2168_v30, %v3108_v55  ;;  %v2170_v32 = vpop.eup %2169  ;;  %vm1139_vm7 = vweird.f32 %v2164_v44  ;;  %v896_v35 = vpop.permute.xlu0 %895  ;;  %v3533_v63 = vld [vmem:[#allocation28_spill] sm:$0xff] }
 0x372   :  { %vm1034_vm8 = vweird.f32 %v2168_v30  ;;  %v1044_v23 = vmul.f32 %v2170_v32, %v3115_v28  ;;  %v1159_v7 = vand.u32 2147483648, %v3154_v10  ;;  %v1157_v20 = vand.u32 2147483647, %v3154_v10  ;;  %vm1140_vm9 = vmor %vm1138_vm0, %vm1139_vm7 }
 0x373   :  { %v1126_v15 = vsel %vm1125_vm5, %v2160_v1, %v1122_v47  ;;  %v1136_v17 = vmul.f32 %v2164_v44, %v1135_v51  ;;  %v1030_v19 = vsub.f32 1.0, %v1029_v43  ;;  %vm3177_vm10 = vcmp.eq.f32.partialorder %v1052_v38, 8.507059e+37  ;;  %vm1035_vm13 = vmor %vm1033_vm3, %vm1034_vm8 }
 0x374   :  { %v1131_v16 = vsel %vm3140_vm15, %v1130_v39, %v1126_v15  ;;  %v1045_v1 = vsub.f32 1.0, %v1044_v23  ;;  %v1055_v45 = vor.u32 1.1754944e-38, %v1054_v11  ;;  %2173 = vrcp.f32 %v3166_v27 }
 0x375   :  { %v1137_v34 = vadd.f32 %v2164_v44, %v1136_v17  ;;  %v1246_v24 = vmul.f32 %v1131_v16, %v3530_v26  ;;  %v1031_v59 = vmul.f32 %v2168_v30, %v1030_v19  ;;  %vm1049_vm11 = vweird.f32 %v2170_v32 }
 0x376   :  { %vm1153_vm12 = vweird.f32 %v3154_v10  ;;  %v2073_v39 = vmul.f32 -1.442695, %v3113_v53  ;;  %v2172_v58 = vpop.eup %2171  ;;  %v1046_v3 = vmul.f32 %v2170_v32, %v1045_v1  ;;  %v1160_v18 = vor.u32 1.1754944e-38, %v1159_v7  ;;  %vm1050_vm15 = vmor %vm1048_vm6, %vm1049_vm11 }
 0x377   :  { %v1141_v12 = vsel %vm1140_vm9, %v2164_v44, %v1137_v34  ;;  %1262 = vst [vmem:[#allocation7 + $0x40] sm:$0xff] %v1246_v24  ;;  %v1032_v5 = vadd.f32 %v2168_v30, %v1031_v59  ;;  %v1586_v44 = vadd.f32 %v3136_v36, %v3026_v25  ;;  %v1149_v43 = vmul.f32 %v2172_v58, %v3154_v10  ;;  %v3536_v25 = vld [vmem:[#allocation20_spill] sm:$0xff]  ;;  %v3537_v24 = vld [vmem:[#allocation21_spill] sm:$0xff]  ;;  %v875_v10 = vpop.f32.mrf.mxu2 }
 0x378   :  { %v1146_v52 = vsel %vm3149_vm2, %v1145_v54, %v1141_v12  ;;  %vm3193_vm14 = vcmp.eq.f32.partialorder %v1157_v20, 8.507059e+37  ;;  %v1172_v4 = vand.u32 2147483647, %v3166_v27  ;;  %v911_v54 = vpop.permute.xlu1 %910  ;;  %v1047_v38 = vadd.f32 %v2170_v32, %v1046_v3  ;;  %v846_v20 = vpop.f32.mrf.mxu0 }
 0x379   :  { %v1247_v47 = vmul.f32 %v1146_v52, %v3533_v63  ;;  %v1036_v51 = vsel %vm1035_vm13, %v2168_v30, %v1032_v5  ;;  %v1174_v11 = vand.u32 2147483648, %v3166_v27  ;;  %2175 = vpow2.f32 %v2073_v39  ;;  %v916_v52 = vpop.permute.xlu0 %915 }
 0x37a   :  { %v1041_v55 = vsel %vm3157_vm4, %v1040_v48, %v1036_v51  ;;  %v1150_v15 = vsub.f32 1.0, %v1149_v43  ;;  %v2077_v17 = vmul.f32 -1.442695, %v1586_v44  ;;  %v922_v19 = vadd.f32 %v3147_v8, %v3055_v0  ;;  %v2174_v16 = vpop.eup %2173 }
 0x37b   :  { %1263 = vst [vmem:[#allocation7 + $0x48] sm:$0xff] %v1247_v47  ;;  %v1240_v30 = vmul.f32 %v1041_v55, %v3536_v25  ;;  %v1051_v23 = vsel %vm1050_vm15, %v2170_v32, %v1047_v38  ;;  %v923_v61 = vadd.f32 %v3147_v8, %v3035_v40  ;;  %v930_v48 = vadd.f32 %v911_v54, %v3074_v9  ;;  %v3538_v47 = vld [vmem:[#allocation29_spill] sm:$0xff]  ;;  %v3539_v25 = vld [vmem:[#allocation30_spill] sm:$0xff] }
 0x37c   :  { %v931_v7 = vadd.f32 %v911_v54, %v3051_v62  ;;  %v1056_v28 = vsel %vm3177_vm10, %v1055_v45, %v1051_v23  ;;  %v1151_v34 = vmul.f32 %v2172_v58, %v1150_v15  ;;  %vm1154_vm0 = vweird.f32 %v2172_v58 }
 0x37d   :  { %1256 = vst [vmem:[#allocation7 + $0x10] sm:$0xff] %v1240_v30  ;;  %v1164_v26 = vmul.f32 %v2174_v16, %v3166_v27  ;;  %v1241_v59 = vmul.f32 %v1056_v28, %v3537_v24  ;;  %2177 = vpow2.f32 %v2077_v17  ;;  %v2025_v0 = vmul.f32 -1.442695, %v922_v19  ;;  %vm1155_vm2 = vmor %vm1153_vm12, %vm1154_vm0 }
 0x37e   :  { %v2026_v32 = vmul.f32 -1.442695, %v923_v61  ;;  %v1152_v1 = vadd.f32 %v2172_v58, %v1151_v34  ;;  %vm1169_vm1 = vweird.f32 %v2174_v16  ;;  %v2033_v9 = vmul.f32 -1.442695, %v930_v48 }
 0x37f   :  { %v1165_v40 = vsub.f32 1.0, %v1164_v26  ;;  %v2176_v8 = vpop.eup %2175  ;;  %1257 = vst [vmem:[#allocation7 + $0x18] sm:$0xff] %v1241_v59  ;;  %2179 = vpow2.f32 %v2025_v0  ;;  %v2034_v62 = vmul.f32 -1.442695, %v931_v7  ;;  %v924_v29 = vadd.f32 %v896_v35, %v3069_v6 }
 0x380   :  { %v925_v45 = vadd.f32 %v896_v35, %v3043_v14  ;;  %v1156_v12 = vsel %vm1155_vm2, %v2172_v58, %v1152_v1  ;;  %v3219_v39 = vadd.f32 1.0, %v2176_v8  ;;  %2181 = vpow2.f32 %v2026_v32  ;;  %v3254_v0 = vpop.permute.xlu1 %1563 }
 0x381   :  { %v1166_v5 = vmul.f32 %v2174_v16, %v1165_v40  ;;  %v847_v3 = vadd.f32 %v846_v20, %v2967_v21  ;;  %v1161_v44 = vsel %vm3193_vm14, %v1160_v18, %v1156_v12  ;;  %2183 = vpow2.f32 %v2033_v9 }
 0x382   :  { %vm1168_vm3 = vweird.f32 %v3166_v27  ;;  %v1248_v6 = vmul.f32 %v1161_v44, %v3538_v47  ;;  %2185 = vrcp.f32 %v3219_v39  ;;  %v1175_v35 = vor.u32 1.1754944e-38, %v1174_v11 }
 0x383   :  { %v1167_v63 = vadd.f32 %v2174_v16, %v1166_v5  ;;  %v2178_v14 = vpop.eup %2177  ;;  %vm1170_vm4 = vmor %vm1168_vm3, %vm1169_vm1  ;;  %2187 = vpow2.f32 %v2034_v62  ;;  %v2027_v58 = vmul.f32 -1.442695, %v924_v29  ;;  %v932_v51 = vadd.f32 %v916_v52, %v847_v3 }
 0x384   :  { %vm1173_vm5 = vcmp.eq.f32.partialorder %v1172_v4, 8.507059e+37  ;;  %1264 = vst [vmem:[#allocation7 + $0x50] sm:$0xff] %v1248_v6  ;;  %v3228_v18 = vadd.f32 1.0, %v2178_v14  ;;  %v2028_v53 = vmul.f32 -1.442695, %v925_v45  ;;  %v876_v27 = vadd.f32 %v875_v10, %v2967_v21 }
 0x385   :  { %v1171_v43 = vsel %vm1170_vm4, %v2174_v16, %v1167_v63  ;;  %v2180_v54 = vpop.eup %2179  ;;  %v1671_v15 = vand.u32 2147483647, %v3219_v39  ;;  %v1673_v11 = vand.u32 2147483648, %v3219_v39  ;;  %v2035_v16 = vmul.f32 -1.442695, %v932_v51 }
 0x386   :  { %v1176_v55 = vsel %vm1173_vm5, %v1175_v35, %v1171_v43  ;;  %v2182_v38 = vpop.eup %2181  ;;  %2189 = vrcp.f32 %v3228_v18  ;;  %v3235_v19 = vadd.f32 1.0, %v2180_v54  ;;  %v1509_v21 = vadd.f32 %v2965_v22, %v2991_v57 }
 0x387   :  { %v1249_v30 = vmul.f32 %v1176_v55, %v3539_v25  ;;  %v2184_v17 = vpop.eup %2183  ;;  %v3237_v4 = vadd.f32 1.0, %v2182_v38  ;;  %2191 = vpow2.f32 %v2027_v58  ;;  %vm1667_vm6 = vweird.f32 %v3219_v39 }
 0x388   :  { %v2186_v23 = vpop.eup %2185  ;;  %v3242_v61 = vadd.f32 1.0, %v2184_v17  ;;  %2193 = vpow2.f32 %v2028_v53  ;;  %v1731_v28 = vand.u32 2147483647, %v3228_v18  ;;  %v933_v34 = vadd.f32 %v916_v52, %v876_v27 }
 0x389   :  { %1265 = vst [vmem:[#allocation7 + $0x58] sm:$0xff] %v1249_v30  ;;  %v2188_v48 = vpop.eup %2187  ;;  %v1663_v7 = vmul.f32 %v2186_v23, %v3219_v39  ;;  %2195 = vrcp.f32 %v3235_v19  ;;  %vm3247_vm7 = vcmp.eq.f32.partialorder %v1671_v15, 8.507059e+37  ;;  %v1674_v24 = vor.u32 1.1754944e-38, %v1673_v11  ;;  %v3548_v11 = vld [vmem:[#allocation11_spill] sm:$0xff] }
 0x38a   :  { %v1733_v22 = vand.u32 2147483648, %v3228_v18  ;;  %2197 = vrcp.f32 %v3237_v4  ;;  %vm1668_vm8 = vweird.f32 %v2186_v23  ;;  %vm1727_vm9 = vweird.f32 %v3228_v18 }
 0x38b   :  { %v1664_v59 = vsub.f32 1.0, %v1663_v7  ;;  %2199 = vpow2.f32 %v2035_v16  ;;  %v1067_v20 = vand.u32 2147483647, %v3235_v19  ;;  %v1069_v1 = vand.u32 2147483648, %v3235_v19  ;;  %vm1669_vm13 = vmor %vm1667_vm6, %vm1668_vm8 }
 0x38c   :  { %v2190_v32 = vpop.eup %2189  ;;  %v3258_v40 = vadd.f32 1.0, %v2188_v48  ;;  %2201 = vrcp.f32 %v3242_v61  ;;  %vm3262_vm10 = vcmp.eq.f32.partialorder %v1731_v28, 8.507059e+37  ;;  %v1082_v45 = vand.u32 2147483647, %v3237_v4 }
 0x38d   :  { %v2192_v9 = vpop.eup %2191  ;;  %v1665_v8 = vmul.f32 %v2186_v23, %v1664_v59  ;;  %v1723_v62 = vmul.f32 %v2190_v32, %v3228_v18  ;;  %v1084_v12 = vand.u32 2147483648, %v3237_v4  ;;  %v1734_v52 = vor.u32 1.1754944e-38, %v1733_v22  ;;  %v3549_v18 = vld [vmem:[#allocation18_spill] sm:$0xff] }
 0x38e   :  { %v2194_v5 = vpop.eup %2193  ;;  %vm1063_vm11 = vweird.f32 %v3235_v19  ;;  %v3269_v3 = vmul.f32 -1.442695, %v933_v34  ;;  %v3272_v44 = vadd.f32 %v3254_v0, %v1509_v21  ;;  %vm1078_vm12 = vweird.f32 %v3237_v4 }
 0x38f   :  { %v2196_v10 = vpop.eup %2195  ;;  %v1666_v63 = vadd.f32 %v2186_v23, %v1665_v8  ;;  %v1724_v47 = vsub.f32 1.0, %v1723_v62  ;;  %2203 = vrcp.f32 %v3258_v40  ;;  %vm1728_vm14 = vweird.f32 %v2190_v32 }
 0x390   :  { %v2198_v6 = vpop.eup %2197  ;;  %v1059_v14 = vmul.f32 %v2196_v10, %v3235_v19  ;;  %vm3280_vm15 = vcmp.eq.f32.partialorder %v1067_v20, 8.507059e+37  ;;  %v1070_v58 = vor.u32 1.1754944e-38, %v1069_v1  ;;  %v1189_v51 = vand.u32 2147483648, %v3242_v61  ;;  %vm1729_vm2 = vmor %vm1727_vm9, %vm1728_vm14 }
 0x391   :  { %v3285_v43 = vpop.eup %2199  ;;  %v1670_v53 = vsel %vm1669_vm13, %v2186_v23, %v1666_v63  ;;  %v1725_v54 = vmul.f32 %v2190_v32, %v1724_v47  ;;  %v1074_v27 = vmul.f32 %v2198_v6, %v3237_v4  ;;  %vm3288_vm0 = vcmp.eq.f32.partialorder %v1082_v45, 8.507059e+37 }
 0x392   :  { %v1085_v39 = vor.u32 1.1754944e-38, %v1084_v12  ;;  %v2202_v38 = vpop.eup %2201  ;;  %v1675_v25 = vsel %vm3247_vm7, %v1674_v24, %v1670_v53  ;;  %v1060_v30 = vsub.f32 1.0, %v1059_v14  ;;  %vm1183_vm1 = vweird.f32 %v3242_v61 }
 0x393   :  { %v1187_v15 = vand.u32 2147483647, %v3242_v61  ;;  %v1902_v17 = vmul.f32 %v1675_v25, %v3548_v11  ;;  %v1726_v16 = vadd.f32 %v2190_v32, %v1725_v54  ;;  %v1075_v23 = vsub.f32 1.0, %v1074_v27 }
 0x394   :  { %v1179_v21 = vmul.f32 %v2202_v38, %v3242_v61  ;;  %v1061_v48 = vmul.f32 %v2196_v10, %v1060_v30  ;;  %vm1064_vm3 = vweird.f32 %v2196_v10  ;;  %vm1079_vm4 = vweird.f32 %v2198_v6  ;;  %v1518_v61 = vpop.f32.mrf.mxu3 }
 0x395   :  { %v1190_v7 = vor.u32 1.1754944e-38, %v1189_v51  ;;  %v2204_v28 = vpop.eup %2203  ;;  %1919 = vst [vmem:[#allocation7 + $0x80] sm:$0xff] %v1902_v17  ;;  %v1730_v34 = vsel %vm1729_vm2, %v2190_v32, %v1726_v16  ;;  %v1076_v26 = vmul.f32 %v2198_v6, %v1075_v23  ;;  %v3301_v22 = vadd.f32 1.0, %v2192_v9  ;;  %vm1065_vm6 = vmor %vm1063_vm11, %vm1064_vm3  ;;  %v3551_v51 = vld [vmem:[#allocation14_spill] sm:$0xff]  ;;  %v3340_v16 = vpop.permute.xlu0 %1579 }
 0x396   :  { %v1180_v24 = vsub.f32 1.0, %v1179_v21  ;;  %v1735_v59 = vsel %vm3262_vm10, %v1734_v52, %v1730_v34  ;;  %v1062_v20 = vadd.f32 %v2196_v10, %v1061_v48  ;;  %vm1184_vm5 = vweird.f32 %v2202_v38  ;;  %vm1080_vm7 = vmor %vm1078_vm12, %vm1079_vm4  ;;  %v3553_v21 = vld [vmem:[#allocation34_spill] sm:$0xff] }
 0x397   :  { %v1194_v1 = vmul.f32 %v2204_v28, %v3258_v40  ;;  %v1906_v8 = vmul.f32 %v1735_v59, %v3549_v18  ;;  %v1077_v62 = vadd.f32 %v2198_v6, %v1076_v26  ;;  %v3309_v12 = vadd.f32 1.0, %v2194_v5  ;;  %vm1185_vm8 = vmor %vm1183_vm1, %vm1184_vm5 }
 0x398   :  { %v1181_v45 = vmul.f32 %v2202_v38, %v1180_v24  ;;  %v1066_v32 = vsel %vm1065_vm6, %v2196_v10, %v1062_v20  ;;  %v1202_v29 = vand.u32 2147483647, %v3258_v40  ;;  %2205 = vrcp.f32 %v3301_v22  ;;  %v3550_v10 = vld [vmem:[#allocation13_spill] sm:$0xff] }
 0x399   :  { %v1195_v9 = vsub.f32 1.0, %v1194_v1  ;;  %1923 = vst [vmem:[#allocation7 + $0xa0] sm:$0xff] %v1906_v8  ;;  %v1071_v52 = vsel %vm3280_vm15, %v1070_v58, %v1066_v32  ;;  %v1081_v19 = vsel %vm1080_vm7, %v2198_v6, %v1077_v62  ;;  %v1204_v47 = vand.u32 2147483648, %v3258_v40  ;;  %v3327_v6 = vpop.permute.xlu1 %1571 }
 0x39a   :  { %v1182_v63 = vadd.f32 %v2202_v38, %v1181_v45  ;;  %v1086_v5 = vsel %vm3288_vm0, %v1085_v39, %v1081_v19  ;;  %v1242_v14 = vmul.f32 %v1071_v52, %v3550_v10  ;;  %vm1199_vm9 = vweird.f32 %v2204_v28  ;;  %v3552_v39 = vld [vmem:[#allocation33_spill] sm:$0xff] }
 0x39b   :  { %v1196_v4 = vmul.f32 %v2204_v28, %v1195_v9  ;;  %v1243_v53 = vmul.f32 %v1086_v5, %v3551_v51  ;;  %vm1188_vm10 = vcmp.eq.f32.partialorder %v1187_v15, 8.507059e+37  ;;  %2207 = vrcp.f32 %v3309_v12 }
 0x39c   :  { %v1186_v54 = vsel %vm1185_vm8, %v2202_v38, %v1182_v63  ;;  %v1514_v35 = vadd.f32 %v2989_v60, %v3004_v13  ;;  %1258 = vst [vmem:[#allocation7 + $0x20] sm:$0xff] %v1242_v14  ;;  %vm1198_vm11 = vweird.f32 %v3258_v40  ;;  %vm1203_vm13 = vcmp.eq.f32.partialorder %v1202_v29, 8.507059e+37 }
 0x39d   :  { %v1191_v58 = vsel %vm1188_vm10, %v1190_v7, %v1186_v54  ;;  %v1197_v27 = vadd.f32 %v2204_v28, %v1196_v4  ;;  %1259 = vst [vmem:[#allocation7 + $0x28] sm:$0xff] %v1243_v53  ;;  %vm1200_vm12 = vmor %vm1198_vm11, %vm1199_vm9  ;;  %v1205_v55 = vor.u32 1.1754944e-38, %v1204_v47  ;;  %2209 = vpow2.f32 %v3269_v3  ;;  %v1530_v3 = vpop.f32.mrf.mxu1  ;;  %v3554_v53 = vld [vmem:[#allocation24_spill] sm:$0xff] }
 0x39e   :  { %v1250_v38 = vmul.f32 %v1191_v58, %v3552_v39  ;;  %v2206_v25 = vpop.eup %2205  ;;  %v3335_v15 = vadd.f32 1.0, %v3285_v43  ;;  %v2079_v60 = vmul.f32 -1.442695, %v3272_v44  ;;  %v1592_v11 = vadd.f32 %v3327_v6, %v1514_v35 }
 0x39f   :  { %v1201_v30 = vsel %vm1200_vm12, %v2204_v28, %v1197_v27  ;;  %v1089_v40 = vmul.f32 %v2206_v25, %v3301_v22  ;;  %v1519_v23 = vadd.f32 %v1518_v61, %v3014_v49  ;;  %v1097_v28 = vand.u32 2147483647, %v3301_v22 }
 0x3a0   :  { %v1206_v17 = vsel %vm1203_vm13, %v1205_v55, %v1201_v30  ;;  %1266 = vst [vmem:[#allocation7 + $0x60] sm:$0xff] %v1250_v38  ;;  %2211 = vrcp.f32 %v3335_v15  ;;  %v1099_v44 = vand.u32 2147483648, %v3301_v22  ;;  %v2083_v26 = vmul.f32 -1.442695, %v1592_v11 }
 0x3a1   :  { %v1251_v48 = vmul.f32 %v1206_v17, %v3553_v21  ;;  %v2208_v7 = vpop.eup %2207  ;;  %v1090_v43 = vsub.f32 1.0, %v1089_v40  ;;  %2213 = vpow2.f32 %v2079_v60  ;;  %v1596_v24 = vadd.f32 %v3340_v16, %v1519_v23 }
 0x3a2   :  { %v1104_v34 = vmul.f32 %v2208_v7, %v3309_v12  ;;  %vm1093_vm14 = vweird.f32 %v3301_v22  ;;  %vm1094_vm15 = vweird.f32 %v2206_v25  ;;  %v1114_v1 = vand.u32 2147483648, %v3309_v12 }
 0x3a3   :  { %1267 = vst [vmem:[#allocation7 + $0x68] sm:$0xff] %v1251_v48  ;;  %v2210_v59 = vpop.eup %2209  ;;  %v1091_v20 = vmul.f32 %v2206_v25, %v1090_v43  ;;  %2215 = vpow2.f32 %v2083_v26  ;;  %v1531_v62 = vadd.f32 %v1530_v3, %v2961_v42  ;;  %vm1098_vm0 = vcmp.eq.f32.partialorder %v1097_v28, 8.507059e+37  ;;  %vm1095_vm1 = vmor %vm1093_vm14, %vm1094_vm15 }
 0x3a4   :  { %v1105_v18 = vsub.f32 1.0, %v1104_v34  ;;  %v3351_v8 = vadd.f32 1.0, %v2210_v59  ;;  %v1100_v32 = vor.u32 1.1754944e-38, %v1099_v44  ;;  %v2087_v9 = vmul.f32 -1.442695, %v1596_v24  ;;  %v3556_v24 = vld [vmem:[#allocation38_spill] sm:$0xff] }
 0x3a5   :  { %v1092_v45 = vadd.f32 %v2206_v25, %v1091_v20  ;;  %vm1109_vm2 = vweird.f32 %v2208_v7  ;;  %v1112_v19 = vand.u32 2147483647, %v3309_v12  ;;  %vm1108_vm3 = vweird.f32 %v3309_v12  ;;  %v1532_v51 = vpop.f32.mrf.mxu1 }
 0x3a6   :  { %v2212_v29 = vpop.eup %2211  ;;  %v1106_v52 = vmul.f32 %v2208_v7, %v1105_v18  ;;  %2217 = vrcp.f32 %v3351_v8  ;;  %v1115_v47 = vor.u32 1.1754944e-38, %v1114_v1  ;;  %v1583_v4 = vadd.f32 %v3100_v56, %v1531_v62  ;;  %vm1110_vm4 = vmor %vm1108_vm3, %vm1109_vm2 }
 0x3a7   :  { %v2214_v22 = vpop.eup %2213  ;;  %v1096_v63 = vsel %vm1095_vm1, %v2206_v25, %v1092_v45  ;;  %v1209_v5 = vmul.f32 %v2212_v29, %v3335_v15  ;;  %v1217_v58 = vand.u32 2147483647, %v3335_v15  ;;  %2219 = vpow2.f32 %v2087_v9  ;;  %v3555_v25 = vld [vmem:[#allocation25_spill] sm:$0xff] }
 0x3a8   :  { %v1101_v42 = vsel %vm1098_vm0, %v1100_v32, %v1096_v63  ;;  %v1107_v10 = vadd.f32 %v2208_v7, %v1106_v52  ;;  %v3358_v14 = vadd.f32 1.0, %v2214_v22  ;;  %vm1113_vm5 = vcmp.eq.f32.partialorder %v1112_v19, 8.507059e+37 }
 0x3a9   :  { %v1244_v54 = vmul.f32 %v1101_v42, %v3554_v53  ;;  %v1210_v35 = vsub.f32 1.0, %v1209_v5  ;;  %v2216_v27 = vpop.eup %2215  ;;  %v1219_v12 = vand.u32 2147483648, %v3335_v15  ;;  %vm1214_vm6 = vweird.f32 %v2212_v29 }
 0x3aa   :  { %v1111_v61 = vsel %vm1110_vm4, %v2208_v7, %v1107_v10  ;;  %2221 = vrcp.f32 %v3358_v14  ;;  %v3365_v56 = vadd.f32 1.0, %v2216_v27  ;;  %v2074_v60 = vmul.f32 -1.442695, %v1583_v4  ;;  %v3559_v4 = vld [vmem:[#allocation39_spill] sm:$0xff] }
 0x3ab   :  { %v1116_v55 = vsel %vm1113_vm5, %v1115_v47, %v1111_v61  ;;  %1260 = vst [vmem:[#allocation7 + $0x30] sm:$0xff] %v1244_v54  ;;  %v1211_v39 = vmul.f32 %v2212_v29, %v1210_v35  ;;  %v1533_v11 = vadd.f32 %v1532_v51, %v2977_v33  ;;  %vm1213_vm7 = vweird.f32 %v3335_v15 }
 0x3ac   :  { %v2218_v38 = vpop.eup %2217  ;;  %v1245_v30 = vmul.f32 %v1116_v55, %v3555_v25  ;;  %vm1218_vm8 = vcmp.eq.f32.partialorder %v1217_v58, 8.507059e+37  ;;  %vm1215_vm9 = vmor %vm1213_vm7, %vm1214_vm6  ;;  %v1220_v23 = vor.u32 1.1754944e-38, %v1219_v12  ;;  %v1232_v21 = vand.u32 2147483647, %v3351_v8  ;;  %v3562_v25 = vld [vmem:[#allocation22_spill] sm:$0xff] }
 0x3ad   :  { %v1212_v17 = vadd.f32 %v2212_v29, %v1211_v39  ;;  %v1224_v40 = vmul.f32 %v2218_v38, %v3351_v8  ;;  %v1234_v48 = vand.u32 2147483648, %v3351_v8  ;;  %2223 = vrcp.f32 %v3365_v56  ;;  %v2220_v3 = vpop.eup %2219  ;;  %v1535_v34 = vpop.f32.mrf.mxu1 }
 0x3ae   :  { %1261 = vst [vmem:[#allocation7 + $0x38] sm:$0xff] %v1245_v30  ;;  %2225 = vpow2.f32 %v2074_v60  ;;  %v1585_v33 = vadd.f32 %v2996_v46, %v1533_v11  ;;  %v3375_v44 = vadd.f32 1.0, %v2220_v3  ;;  %vm1229_vm10 = vweird.f32 %v2218_v38 }
 0x3af   :  { %v1216_v7 = vsel %vm1215_vm9, %v2212_v29, %v1212_v17  ;;  %v1225_v43 = vsub.f32 1.0, %v1224_v40  ;;  %vm1228_vm11 = vweird.f32 %v3351_v8  ;;  %vm3380_vm12 = vcmp.eq.f32.partialorder %v1232_v21, 8.507059e+37 }
 0x3b0   :  { %v2222_v28 = vpop.eup %2221  ;;  %v1221_v15 = vsel %vm1218_vm8, %v1220_v23, %v1216_v7  ;;  %v1235_v18 = vor.u32 1.1754944e-38, %v1234_v48  ;;  %2227 = vrcp.f32 %v3375_v44  ;;  %v2076_v45 = vmul.f32 -1.442695, %v1585_v33  ;;  %vm1230_vm13 = vmor %vm1228_vm11, %vm1229_vm10 }
 0x3b1   :  { %v1226_v26 = vmul.f32 %v2218_v38, %v1225_v43  ;;  %v1252_v59 = vmul.f32 %v1221_v15, %v3556_v24  ;;  %v1753_v20 = vmul.f32 %v2222_v28, %v3358_v14  ;;  %v1536_v32 = vadd.f32 %v1535_v34, %v2971_v41 }
 0x3b2   :  { %v1761_v29 = vand.u32 2147483647, %v3358_v14  ;;  %v1763_v52 = vand.u32 2147483648, %v3358_v14  ;;  %v1821_v8 = vand.u32 2147483647, %v3365_v56  ;;  %v1823_v19 = vand.u32 2147483648, %v3365_v56 }
 0x3b3   :  { %v1227_v46 = vadd.f32 %v2218_v38, %v1226_v26  ;;  %1268 = vst [vmem:[#allocation7 + $0x70] sm:$0xff] %v1252_v59  ;;  %v1754_v62 = vsub.f32 1.0, %v1753_v20  ;;  %v2224_v9 = vpop.eup %2223  ;;  %vm1758_vm14 = vweird.f32 %v2222_v28  ;;  %2229 = vpow2.f32 %v2076_v45  ;;  %v3564_v45 = vld [vmem:[#allocation36_spill] sm:$0xff] }
 0x3b4   :  { %v2226_v22 = vpop.eup %2225  ;;  %v1813_v5 = vmul.f32 %v2224_v9, %v3365_v56  ;;  %v1587_v10 = vadd.f32 %v3136_v36, %v1536_v32  ;;  %vm1757_vm15 = vweird.f32 %v3358_v14  ;;  %vm1762_vm1 = vcmp.eq.f32.partialorder %v1761_v29, 8.507059e+37 }
 0x3b5   :  { %v1231_v63 = vsel %vm1230_vm13, %v2218_v38, %v1227_v46  ;;  %v1755_v47 = vmul.f32 %v2222_v28, %v1754_v62  ;;  %v3393_v41 = vadd.f32 1.0, %v2226_v22  ;;  %vm1759_vm0 = vmor %vm1757_vm15, %vm1758_vm14  ;;  %v1764_v58 = vor.u32 1.1754944e-38, %v1763_v52  ;;  %v1537_v27 = vpop.f32.mrf.mxu1 }
 0x3b6   :  { %v1236_v42 = vsel %vm3380_vm12, %v1235_v18, %v1231_v63  ;;  %v1814_v54 = vsub.f32 1.0, %v1813_v5  ;;  %v2228_v35 = vpop.eup %2227  ;;  %vm1817_vm2 = vweird.f32 %v3365_v56  ;;  %vm1818_vm3 = vweird.f32 %v2224_v9 }
 0x3b7   :  { %v1253_v51 = vmul.f32 %v1236_v42, %v3559_v4  ;;  %v1756_v53 = vadd.f32 %v2222_v28, %v1755_v47  ;;  %2231 = vrcp.f32 %v3393_v41  ;;  %v1873_v36 = vmul.f32 %v2228_v35, %v3375_v44  ;;  %vm1819_vm5 = vmor %vm1817_vm2, %vm1818_vm3  ;;  %v3565_v4 = vld [vmem:[#allocation12_spill] sm:$0xff] }
 0x3b8   :  { %v1815_v12 = vmul.f32 %v2224_v9, %v1814_v54  ;;  %vm3401_vm4 = vcmp.eq.f32.partialorder %v1821_v8, 8.507059e+37  ;;  %v1824_v14 = vor.u32 1.1754944e-38, %v1823_v19  ;;  %v2078_v38 = vmul.f32 -1.442695, %v1587_v10 }
 0x3b9   :  { %1269 = vst [vmem:[#allocation7 + $0x78] sm:$0xff] %v1253_v51  ;;  %v1760_v61 = vsel %vm1759_vm0, %v2222_v28, %v1756_v53  ;;  %v1874_v11 = vsub.f32 1.0, %v1873_v36  ;;  %v1538_v17 = vadd.f32 %v1537_v27, %v2991_v57  ;;  %v2230_v40 = vpop.eup %2229  ;;  %vm1878_vm6 = vweird.f32 %v2228_v35  ;;  %v3563_v28 = vld [vmem:[#allocation31_spill] sm:$0xff] }
 0x3ba   :  { %v1765_v55 = vsel %vm1762_vm1, %v1764_v58, %v1760_v61  ;;  %v1816_v60 = vadd.f32 %v2224_v9, %v1815_v12  ;;  %v1881_v23 = vand.u32 2147483647, %v3375_v44  ;;  %v1883_v21 = vand.u32 2147483648, %v3375_v44 }
 0x3bb   :  { %v1908_v30 = vmul.f32 %v1765_v55, %v3562_v25  ;;  %2233 = vpow2.f32 %v2078_v38  ;;  %v1875_v3 = vmul.f32 %v2228_v35, %v1874_v11  ;;  %v1649_v7 = vadd.f32 1.0, %v2230_v40 }
 0x3bc   :  { %v1820_v48 = vsel %vm1819_vm5, %v2224_v9, %v1816_v60  ;;  %v1589_v43 = vadd.f32 %v3254_v0, %v1538_v17  ;;  %vm1877_vm7 = vweird.f32 %v3375_v44  ;;  %vm1882_vm9 = vcmp.eq.f32.partialorder %v1881_v23, 8.507059e+37 }
 0x3bd   :  { %1925 = vst [vmem:[#allocation7 + $0xb0] sm:$0xff] %v1908_v30  ;;  %v2232_v33 = vpop.eup %2231  ;;  %v1825_v57 = vsel %vm3401_vm4, %v1824_v14, %v1820_v48  ;;  %v1876_v56 = vadd.f32 %v2228_v35, %v1875_v3  ;;  %vm1879_vm8 = vmor %vm1877_vm7, %vm1878_vm6  ;;  %v1884_v26 = vor.u32 1.1754944e-38, %v1883_v21  ;;  %2235 = vrcp.f32 %v1649_v7  ;;  %v1540_v24 = vpop.f32.mrf.mxu1 }
 0x3be   :  { %v1912_v15 = vmul.f32 %v1825_v57, %v3563_v28  ;;  %v1678_v34 = vmul.f32 %v2232_v33, %v3393_v41  ;;  %v2080_v20 = vmul.f32 -1.442695, %v1589_v43  ;;  %v1541_v1 = vadd.f32 %v1540_v24, %v2981_v31 }
 0x3bf   :  { %v1880_v59 = vsel %vm1879_vm8, %v2228_v35, %v1876_v56  ;;  %vm1683_vm10 = vweird.f32 %v2232_v33  ;;  %v1686_v62 = vand.u32 2147483647, %v3393_v41  ;;  %v1688_v44 = vand.u32 2147483648, %v3393_v41 }
 0x3c0   :  { %1929 = vst [vmem:[#allocation7 + $0xd0] sm:$0xff] %v1912_v15  ;;  %v1679_v0 = vsub.f32 1.0, %v1678_v34  ;;  %v1885_v46 = vsel %vm1882_vm9, %v1884_v26, %v1880_v59  ;;  %2237 = vpow2.f32 %v2080_v20  ;;  %v1591_v52 = vadd.f32 %v2984_v37, %v1541_v1  ;;  %v3567_v34 = vld [vmem:[#allocation19_spill] sm:$0xff] }
 0x3c1   :  { %v2234_v18 = vpop.eup %2233  ;;  %v1916_v32 = vmul.f32 %v1885_v46, %v3564_v45  ;;  %vm1682_vm11 = vweird.f32 %v3393_v41  ;;  %v1689_v19 = vor.u32 1.1754944e-38, %v1688_v44  ;;  %vm1687_vm13 = vcmp.eq.f32.partialorder %v1686_v62, 8.507059e+37 }
 0x3c2   :  { %v1680_v9 = vmul.f32 %v2232_v33, %v1679_v0  ;;  %v1651_v29 = vadd.f32 1.0, %v2234_v18  ;;  %vm1684_vm12 = vmor %vm1682_vm11, %vm1683_vm10  ;;  %v2082_v22 = vmul.f32 -1.442695, %v1591_v52  ;;  %v1716_v54 = vand.u32 2147483647, %v1649_v7 }
 0x3c3   :  { %1933 = vst [vmem:[#allocation7 + $0xf0] sm:$0xff] %v1916_v32  ;;  %v2236_v31 = vpop.eup %2235  ;;  %v1718_v35 = vand.u32 2147483648, %v1649_v7  ;;  %vm1712_vm15 = vweird.f32 %v1649_v7 }
 0x3c4   :  { %v1681_v8 = vadd.f32 %v2232_v33, %v1680_v9  ;;  %2239 = vrcp.f32 %v1651_v29  ;;  %v1708_v47 = vmul.f32 %v2236_v31, %v1649_v7  ;;  %vm1713_vm14 = vweird.f32 %v2236_v31 }
 0x3c5   :  { %2241 = vpow2.f32 %v2082_v22  ;;  %v1542_v42 = vpop.f32.mrf.mxu1  ;;  %vm1714_vm0 = vmor %vm1712_vm15, %vm1713_vm14  ;;  %vm1717_vm1 = vcmp.eq.f32.partialorder %v1716_v54, 8.507059e+37  ;;  %v1719_v14 = vor.u32 1.1754944e-38, %v1718_v35  ;;  %v1746_v25 = vand.u32 2147483647, %v1651_v29 }
 0x3c6   :  { %v1685_v63 = vsel %vm1684_vm12, %v2232_v33, %v1681_v8  ;;  %v2238_v10 = vpop.eup %2237  ;;  %v1709_v53 = vsub.f32 1.0, %v1708_v47  ;;  %v1543_v37 = vadd.f32 %v1542_v42, %v3004_v13  ;;  %v1748_v30 = vand.u32 2147483648, %v1651_v29 }
 0x3c7   :  { %v1690_v5 = vsel %vm1687_vm13, %v1689_v19, %v1685_v63  ;;  %v1653_v41 = vadd.f32 1.0, %v2238_v10  ;;  %vm1742_vm3 = vweird.f32 %v1651_v29  ;;  %vm1747_vm5 = vcmp.eq.f32.partialorder %v1746_v25, 8.507059e+37  ;;  %v3568_v19 = vld [vmem:[#allocation23_spill] sm:$0xff] }
 0x3c8   :  { %v1903_v51 = vmul.f32 %v1690_v5, %v3565_v4  ;;  %v1710_v27 = vmul.f32 %v2236_v31, %v1709_v53  ;;  %v1593_v61 = vadd.f32 %v3327_v6, %v1543_v37  ;;  %v3566_v6 = vld [vmem:[#allocation17_spill] sm:$0xff]  ;;  %v1749_v7 = vor.u32 1.1754944e-38, %v1748_v30  ;;  %v3569_v37 = vld [vmem:[#allocation26_spill] sm:$0xff] }
 0x3c9   :  { %2243 = vrcp.f32 %v1653_v41  ;;  %v1778_v24 = vand.u32 2147483648, %v1653_v41  ;;  %v1776_v1 = vand.u32 2147483647, %v1653_v41  ;;  %vm1772_vm7 = vweird.f32 %v1653_v41 }
 0x3ca   :  { %v2240_v58 = vpop.eup %2239  ;;  %1920 = vst [vmem:[#allocation7 + $0x88] sm:$0xff] %v1903_v51  ;;  %v1711_v36 = vadd.f32 %v2236_v31, %v1710_v27  ;;  %v2084_v55 = vmul.f32 -1.442695, %v1593_v61 }
 0x3cb   :  { %v1738_v12 = vmul.f32 %v2240_v58, %v1651_v29  ;;  %v2242_v39 = vpop.eup %2241  ;;  %vm1743_vm2 = vweird.f32 %v2240_v58  ;;  %vm1777_vm9 = vcmp.eq.f32.partialorder %v1776_v1, 8.507059e+37 }
 0x3cc   :  { %v1715_v13 = vsel %vm1714_vm0, %v2236_v31, %v1711_v36  ;;  %v1655_v60 = vadd.f32 1.0, %v2242_v39  ;;  %2245 = vpow2.f32 %v2084_v55  ;;  %vm1744_vm4 = vmor %vm1742_vm3, %vm1743_vm2 }
 0x3cd   :  { %v1739_v38 = vsub.f32 1.0, %v1738_v12  ;;  %v1720_v11 = vsel %vm1717_vm1, %v1719_v14, %v1715_v13  ;;  %v1545_v40 = vpop.f32.mrf.mxu1  ;;  %v3570_v13 = vld [vmem:[#allocation32_spill] sm:$0xff] }
 0x3ce   :  { %v1905_v23 = vmul.f32 %v1720_v11, %v3566_v6  ;;  %2247 = vrcp.f32 %v1655_v60  ;;  %v1546_v3 = vadd.f32 %v1545_v40, %v3001_v2  ;;  %v1806_v9 = vand.u32 2147483647, %v1655_v60 }
 0x3cf   :  { %v1740_v17 = vmul.f32 %v2240_v58, %v1739_v38  ;;  %v2244_v21 = vpop.eup %2243  ;;  %v1808_v29 = vand.u32 2147483648, %v1655_v60  ;;  %vm1802_vm11 = vweird.f32 %v1655_v60 }
 0x3d0   :  { %1922 = vst [vmem:[#allocation7 + $0x98] sm:$0xff] %v1905_v23  ;;  %v1768_v43 = vmul.f32 %v2244_v21, %v1653_v41  ;;  %v1595_v57 = vadd.f32 %v3006_v50, %v1546_v3  ;;  %vm1773_vm6 = vweird.f32 %v2244_v21  ;;  %v1779_v50 = vor.u32 1.1754944e-38, %v1778_v24 }
 0x3d1   :  { %v1741_v48 = vadd.f32 %v2240_v58, %v1740_v17  ;;  %vm1774_vm8 = vmor %vm1772_vm7, %vm1773_vm6  ;;  %v1809_v10 = vor.u32 1.1754944e-38, %v1808_v29  ;;  %vm1807_vm13 = vcmp.eq.f32.partialorder %v1806_v9, 8.507059e+37 }
 0x3d2   :  { %v1769_v15 = vsub.f32 1.0, %v1768_v43  ;;  %v2246_v56 = vpop.eup %2245  ;;  %v2086_v59 = vmul.f32 -1.442695, %v1595_v57 }
 0x3d3   :  { %v1745_v33 = vsel %vm1744_vm4, %v2240_v58, %v1741_v48  ;;  %v1657_v2 = vadd.f32 1.0, %v2246_v56 }
 0x3d4   :  { %v1750_v28 = vsel %vm1747_vm5, %v1749_v7, %v1745_v33  ;;  %v2248_v0 = vpop.eup %2247  ;;  %v1770_v20 = vmul.f32 %v2244_v21, %v1769_v15  ;;  %2249 = vpow2.f32 %v2086_v59  ;;  %v3571_v7 = vld [vmem:[#allocation35_spill] sm:$0xff]  ;;  %v3572_v59 = vld [vmem:[#allocation37_spill] sm:$0xff] }
 0x3d5   :  { %v1907_v26 = vmul.f32 %v1750_v28, %v3567_v34  ;;  %v1798_v18 = vmul.f32 %v2248_v0, %v1655_v60  ;;  %v1547_v46 = vpop.f32.mrf.mxu1  ;;  %2251 = vrcp.f32 %v1657_v2  ;;  %vm1803_vm10 = vweird.f32 %v2248_v0 }
 0x3d6   :  { %v1771_v62 = vadd.f32 %v2244_v21, %v1770_v20  ;;  %v1548_v45 = vadd.f32 %v1547_v46, %v3014_v49  ;;  %vm1804_vm12 = vmor %vm1802_vm11, %vm1803_vm10  ;;  %v1838_v35 = vand.u32 2147483648, %v1657_v2  ;;  %v1836_v58 = vand.u32 2147483647, %v1657_v2 }
 0x3d7   :  { %1924 = vst [vmem:[#allocation7 + $0xa8] sm:$0xff] %v1907_v26  ;;  %v1799_v44 = vsub.f32 1.0, %v1798_v18  ;;  %vm1832_vm15 = vweird.f32 %v1657_v2 }
 0x3d8   :  { %v1775_v32 = vsel %vm1774_vm8, %v2244_v21, %v1771_v62  ;;  %v1597_v31 = vadd.f32 %v3340_v16, %v1548_v45  ;;  %v1839_v36 = vor.u32 1.1754944e-38, %v1838_v35  ;;  %vm1837_vm1 = vcmp.eq.f32.partialorder %v1836_v58, 8.507059e+37 }
 0x3d9   :  { %v1780_v52 = vsel %vm1777_vm9, %v1779_v50, %v1775_v32  ;;  %v1800_v8 = vmul.f32 %v2248_v0, %v1799_v44 }
 0x3da   :  { %v1909_v22 = vmul.f32 %v1780_v52, %v3568_v19  ;;  %v2250_v63 = vpop.eup %2249  ;;  %v2088_v5 = vmul.f32 -1.442695, %v1597_v31 }
 0x3db   :  { %v1801_v47 = vadd.f32 %v2248_v0, %v1800_v8  ;;  %v2252_v42 = vpop.eup %2251  ;;  %v1659_v49 = vadd.f32 1.0, %v2250_v63 }
 0x3dc   :  { %1926 = vst [vmem:[#allocation7 + $0xb8] sm:$0xff] %v1909_v22  ;;  %v1828_v51 = vmul.f32 %v2252_v42, %v1657_v2  ;;  %2253 = vpow2.f32 %v2088_v5  ;;  %vm1833_vm14 = vweird.f32 %v2252_v42 }
 0x3dd   :  { %v1805_v4 = vsel %vm1804_vm12, %v2248_v0, %v1801_v47  ;;  %2255 = vrcp.f32 %v1659_v49  ;;  %vm1834_vm0 = vmor %vm1832_vm15, %vm1833_vm14  ;;  %v1868_v60 = vand.u32 2147483648, %v1659_v49  ;;  %v1866_v17 = vand.u32 2147483647, %v1659_v49 }
 0x3de   :  { %v1810_v53 = vsel %vm1807_vm13, %v1809_v10, %v1805_v4  ;;  %v1829_v16 = vsub.f32 1.0, %v1828_v51  ;;  %vm1862_vm3 = vweird.f32 %v1659_v49 }
 0x3df   :  { %v1911_v54 = vmul.f32 %v1810_v53, %v3569_v37  ;;  %v1869_v23 = vor.u32 1.1754944e-38, %v1868_v60  ;;  %vm1867_vm5 = vcmp.eq.f32.partialorder %v1866_v17, 8.507059e+37 }
 0x3e0   :  { %v1830_v41 = vmul.f32 %v2252_v42, %v1829_v16 }
 0x3e1   :  { %1928 = vst [vmem:[#allocation7 + $0xc8] sm:$0xff] %v1911_v54 }
 0x3e2   :  { %v2254_v27 = vpop.eup %2253  ;;  %v1831_v61 = vadd.f32 %v2252_v42, %v1830_v41 }
 0x3e3   :  { %v2256_v12 = vpop.eup %2255  ;;  %v1661_v55 = vadd.f32 1.0, %v2254_v27 }
 0x3e4   :  { %v1835_v39 = vsel %vm1834_vm0, %v2252_v42, %v1831_v61  ;;  %v1858_v14 = vmul.f32 %v2256_v12, %v1659_v49  ;;  %vm1863_vm2 = vweird.f32 %v2256_v12 }
 0x3e5   :  { %v1840_v38 = vsel %vm1837_vm1, %v1839_v36, %v1835_v39  ;;  %2257 = vrcp.f32 %v1661_v55  ;;  %vm1864_vm4 = vmor %vm1862_vm3, %vm1863_vm2  ;;  %v1898_v57 = vand.u32 2147483648, %v1661_v55  ;;  %v1896_v15 = vand.u32 2147483647, %v1661_v55 }
 0x3e6   :  { %v1913_v25 = vmul.f32 %v1840_v38, %v3570_v13  ;;  %v1859_v30 = vsub.f32 1.0, %v1858_v14  ;;  %vm1892_vm7 = vweird.f32 %v1661_v55 }
 0x3e7   :  { %v1899_v34 = vor.u32 1.1754944e-38, %v1898_v57  ;;  %vm1897_vm9 = vcmp.eq.f32.partialorder %v1896_v15, 8.507059e+37 }
 0x3e8   :  { %1930 = vst [vmem:[#allocation7 + $0xd8] sm:$0xff] %v1913_v25  ;;  %v1860_v11 = vmul.f32 %v2256_v12, %v1859_v30 }
 0x3ea   :  { %v1861_v40 = vadd.f32 %v2256_v12, %v1860_v11 }
 0x3eb   :  { %v2258_v6 = vpop.eup %2257 }
 0x3ec   :  { %v1865_v21 = vsel %vm1864_vm4, %v2256_v12, %v1861_v40  ;;  %v1888_v48 = vmul.f32 %v2258_v6, %v1661_v55  ;;  %vm1893_vm6 = vweird.f32 %v2258_v6 }
 0x3ed   :  { %v1870_v3 = vsel %vm1867_vm5, %v1869_v23, %v1865_v21  ;;  %vm1894_vm8 = vmor %vm1892_vm7, %vm1893_vm6 }
 0x3ee   :  { %v1915_v43 = vmul.f32 %v1870_v3, %v3571_v7  ;;  %v1889_v33 = vsub.f32 1.0, %v1888_v48 }
 0x3f0   :  { %1932 = vst [vmem:[#allocation7 + $0xe8] sm:$0xff] %v1915_v43  ;;  %v1890_v28 = vmul.f32 %v2258_v6, %v1889_v33 }
 0x3f2   :  { %v1891_v56 = vadd.f32 %v2258_v6, %v1890_v28 }
 0x3f4   :  { %v1895_v26 = vsel %vm1894_vm8, %v2258_v6, %v1891_v56 }
 0x3f5   :  { %v1900_v24 = vsel %vm1897_vm9, %v1899_v34, %v1895_v26 }
 0x3f6   :  { %v1917_v0 = vmul.f32 %v1900_v24, %v3572_v59 }
 0x3f8   :  { %1934 = vst [vmem:[#allocation7 + $0xf8] sm:$0xff] %v1917_v0 }
 0x3f9   :  { %1947 = dma.vmem_to_hbm [thread:$0]  %s1940_s9, 4096, %s1942_s17, [#allocation4], %s2338_s21, %s2338_s21, %s2339_s22  }
 0x3fa   :  { %2335 = dma.done.wait [#allocation4], 4096  }
 0x3fb   :  { %2336 = vsyncadd [#allocation4], 4294963200 }
 0x3fc   :  { %1952 = vsyncpa [#allocation3], 1 }
 0x3fd   :  { %1953 = vsyncpa [#allocation6], 1 }
 0x3fe   :  { %1954 = vsyncpa [#allocation4], 1 }

</bundles_post_ra>
